<compile_context>
chip_gen: v6e
topology: v6e:2x2x1
jax: 0.10.0
libtpu: 0.0.40
codegen_flags: <defaults>
</compile_context>

<pallas_src>
import jax
import jax.numpy as jnp
from jax.experimental import pallas as pl
from jax.experimental.pallas import tpu as pltpu

HIDDEN = 512
OUT_DIM = 55      # true fc3 width (torch module)
OUT_PAD = 128     # lane-dense padded fc3 width (multiple of 128)
LANE = 128
SUBLANE = 8


def _round_up(x, m):
    return (x + m - 1) // m * m


def dqn_kernel(x_ref, w1_ref, b1_ref, w2_ref, b2_ref, w3_ref, b3_ref, out_ref):
    # fc1: bf16 MXU inputs, f32 accumulation; bias+ReLU+bf16 downcast fused so
    # the (tb, 512) intermediate lives/spills as bf16, not f32.
    x = x_ref[...].astype(jnp.bfloat16)
    h1 = jnp.dot(x, w1_ref[...], preferred_element_type=jnp.float32)
    h1 = jnp.maximum(h1 + b1_ref[...], 0.0).astype(jnp.bfloat16)
    # fc2 + bias + relu
    h2 = jnp.dot(h1, w2_ref[...], preferred_element_type=jnp.float32)
    h2 = jnp.maximum(h2 + b2_ref[...], 0.0).astype(jnp.bfloat16)
    # fc3 (lane-padded to 128, no activation), f32 output
    y = jnp.dot(h2, w3_ref[...], preferred_element_type=jnp.float32)
    out_ref[...] = (y + b3_ref[...]).astype(out_ref.dtype)


def _choose_batch_tiling(B):
    """(n_tiles, tb): tb <= 512, tb % 8 == 0, >=2 tiles when B > 256, minimal pad."""
    if B <= 256:
        n_tiles = 1
    else:
        n_tiles = max(2, pl.cdiv(B, 512))
    tb = _round_up(pl.cdiv(B, n_tiles), SUBLANE)
    return n_tiles, tb


def dqn_forward(x, params, out_dim=OUT_DIM):
    """x: (B, input_dim) float32.
    params: bf16 (in, out) weights (w1 row-padded to a multiple of 128, w3
    lane-padded to OUT_PAD) + f32 (1, out) biases (b3 lane-padded to OUT_PAD)."""
    w1, b1 = params["w1"], params["b1"]
    w2, b2 = params["w2"], params["b2"]
    w3, b3 = params["w3"], params["b3"]
    B, input_dim = x.shape
    in_pad = w1.shape[0]
    out_pad = w3.shape[1]

    # Lane-pad input features to match the row-padded w1 (zeros contribute 0).
    if in_pad != input_dim:
        x = jnp.pad(x, ((0, 0), (0, in_pad - input_dim)))

    # Balanced batch tiling (see header).
    n_tiles, tb = _choose_batch_tiling(B)
    b_pad = n_tiles * tb
    if b_pad != B:
        x = jnp.pad(x, ((0, b_pad - B), (0, 0)))

    flops = 2 * b_pad * (in_pad * HIDDEN + HIDDEN * HIDDEN + HIDDEN * out_pad)
    bytes_accessed = (b_pad * in_pad * 4                       # x in (f32)
                      + (w1.size + w2.size + w3.size) * 2      # bf16 weights
                      + (b1.size + b2.size + b3.size) * 4      # f32 biases
                      + b_pad * out_pad * 4)                   # out (f32)

    # Realistic VMEM budget: weights (x2 in case they end up double-buffered),
    # double-buffered x/out tiles, plus h1/h2 intermediate/spill allowance.
    weight_bytes = 2 * ((w1.size + w2.size + w3.size) * 2
                        + (b1.size + b2.size + b3.size) * 4)
    io_bytes = 2 * tb * in_pad * 4 + 2 * tb * out_pad * 4
    spill_bytes = 6 * tb * HIDDEN * 4
    vmem_limit = min(max(int(1.25 * (weight_bytes + io_bytes + spill_bytes)),
                         16 * 1024 * 1024), 64 * 1024 * 1024)

    # TODO(synk): for very large input_dim (~>=16K), add a K-tiled fc1 path
    # (reduction grid axis over in_pad + f32 acc scratch + pl.when init) so the
    # resident w1 and x tiles stay inside v7x's 64 MiB VMEM.
    def build(single_buffer_weights):
        # Weights/biases: full-array blocks with a constant block index -> fetched
        # once and held VMEM-resident while x/out tiles are pipelined.
        if single_buffer_weights:
            resident = lambda a: pl.BlockSpec(a.shape, lambda i: (0, 0),
                                              pipeline_mode=pl.Buffered(1))
        else:
            resident = lambda a: pl.BlockSpec(a.shape, lambda i: (0, 0))
        return pl.pallas_call(
            dqn_kernel,
            out_shape=jax.ShapeDtypeStruct((b_pad, out_pad), jnp.float32),
            grid_spec=pltpu.PrefetchScalarGridSpec(
                num_scalar_prefetch=0,
                grid=(n_tiles,),
                in_specs=[
                    pl.BlockSpec((tb, in_pad), lambda i: (i, 0)),   # x tile
                    resident(w1), resident(b1),
                    resident(w2), resident(b2),
                    resident(w3), resident(b3),
                ],
                out_specs=pl.BlockSpec((tb, out_pad), lambda i: (i, 0)),
            ),
            compiler_params=pltpu.CompilerParams(
                dimension_semantics=("parallel",),   # shard batch tiles across v7x TCs
                vmem_limit_bytes=vmem_limit,
            ),
            cost_estimate=pl.CostEstimate(
                flops=flops, transcendentals=0, bytes_accessed=bytes_accessed),
        )

    try:
        out = build(single_buffer_weights=True)(x, w1, b1, w2, b2, w3, b3)
    except Exception:  # pragma: no cover - JAX without BlockSpec pipeline_mode
        out = build(single_buffer_weights=False)(x, w1, b1, w2, b2, w3, b3)

    # Strip batch and lane padding.
    return out[:B, :out_dim]


def init_params(key, input_dim, hidden=HIDDEN, output_dim=OUT_DIM, out_pad=OUT_PAD):
    """Deterministic synthetic init. Weights stored as (in, out) = torch W.T in
    bf16; biases in f32. w1 rows zero-padded to a multiple of 128; fc3
    weight/bias zero-padded to out_pad lanes."""
    in_pad = _round_up(input_dim, LANE)
    k1, k2, k3, k4, k5, k6 = jax.random.split(key, 6)
    s1 = 1.0 / jnp.sqrt(input_dim)
    s2 = 1.0 / jnp.sqrt(hidden)
    w1 = jax.random.uniform(k1, (input_dim, hidden), jnp.float32, -s1, s1)
    w1 = jnp.pad(w1, ((0, in_pad - input_dim), (0, 0)))
    w3 = jax.random.uniform(k5, (hidden, output_dim), jnp.float32, -s2, s2)
    b3 = jax.random.uniform(k6, (1, output_dim), jnp.float32, -s2, s2)
    w3 = jnp.pad(w3, ((0, 0), (0, out_pad - output_dim)))
    b3 = jnp.pad(b3, ((0, 0), (0, out_pad - output_dim)))
    return {
        "w1": w1.astype(jnp.bfloat16),
        "b1": jax.random.uniform(k2, (1, hidden), jnp.float32, -s1, s1),
        "w2": jax.random.uniform(k3, (hidden, hidden), jnp.float32, -s2, s2
                                 ).astype(jnp.bfloat16),
        "b2": jax.random.uniform(k4, (1, hidden), jnp.float32, -s2, s2),
        "w3": w3.astype(jnp.bfloat16),
        "b3": b3,
    }


if __name__ == "__main__":
    key = jax.random.PRNGKey(0)
    kx, kp = jax.random.split(key)

    batch = 2
    input_dim = 64          # small synthetic state-encoding size

    x = jax.random.normal(kx, (batch, input_dim), dtype=jnp.float32)
    params = init_params(kp, input_dim)

    out = dqn_forward(x, params)
    jax.block_until_ready(out)

    # Sanity check vs. plain f32 JAX reference (bf16 weights upcast to f32;
    # tolerance loosened for bf16 activation rounding in the kernel's MXU path).
    w1f = params["w1"].astype(jnp.float32)[:input_dim]
    w2f = params["w2"].astype(jnp.float32)
    w3f = params["w3"].astype(jnp.float32)[:, :OUT_DIM]
    ref = jnp.maximum(x @ w1f + params["b1"], 0.0)
    ref = jnp.maximum(ref @ w2f + params["b2"], 0.0)
    ref = ref @ w3f + params["b3"][:, :OUT_DIM]

    assert out.shape == (batch, OUT_DIM)
    assert jnp.allclose(out, ref, atol=2e-2, rtol=2e-2), (
        float(jnp.max(jnp.abs(out - ref))))

    print("KERNEL_OK")
</pallas_src>

<mosaic_0001>
module attributes {stable_mosaic.version = 11 : i64} {
  func.func @dqn_kernel(%arg0: i32, %arg1: memref<8x128xf32, #tpu.memory_space<vmem>>, %arg2: memref<128x512xbf16, #tpu.memory_space<vmem>>, %arg3: memref<1x512xf32, #tpu.memory_space<vmem>>, %arg4: memref<512x512xbf16, #tpu.memory_space<vmem>>, %arg5: memref<1x512xf32, #tpu.memory_space<vmem>>, %arg6: memref<512x128xbf16, #tpu.memory_space<vmem>>, %arg7: memref<1x128xf32, #tpu.memory_space<vmem>>, %arg8: memref<8x128xf32, #tpu.memory_space<vmem>>) attributes {dimension_semantics = [#tpu.dimension_semantics<parallel>], iteration_bounds = array<i64: 1>, scalar_prefetch = 0 : i64, scratch_operands = 0 : i64, tpu.core_type = #tpu.core_type<tc>, window_params = [{transform_indices = @transform_0, window_bounds = array<i64: 8, 128>}, {pipeline_mode = #tpu.pipeline_mode<synchronous>, transform_indices = @transform_1, window_bounds = array<i64: 128, 512>}, {pipeline_mode = #tpu.pipeline_mode<synchronous>, transform_indices = @transform_2, window_bounds = array<i64: 1, 512>}, {pipeline_mode = #tpu.pipeline_mode<synchronous>, transform_indices = @transform_3, window_bounds = array<i64: 512, 512>}, {pipeline_mode = #tpu.pipeline_mode<synchronous>, transform_indices = @transform_4, window_bounds = array<i64: 1, 512>}, {pipeline_mode = #tpu.pipeline_mode<synchronous>, transform_indices = @transform_5, window_bounds = array<i64: 512, 128>}, {pipeline_mode = #tpu.pipeline_mode<synchronous>, transform_indices = @transform_6, window_bounds = array<i64: 1, 128>}, {transform_indices = @transform_7, window_bounds = array<i64: 8, 128>}]} {
    %c0 = arith.constant 0 : index
    %c0_0 = arith.constant 0 : index
    %0 = vector.load %arg1[%c0, %c0_0] : memref<8x128xf32, #tpu.memory_space<vmem>>, vector<8x128xf32>
    %1 = arith.truncf %0 : vector<8x128xf32> to vector<8x128xbf16>
    %c0_1 = arith.constant 0 : index
    %c0_2 = arith.constant 0 : index
    %2 = vector.load %arg2[%c0_1, %c0_2] : memref<128x512xbf16, #tpu.memory_space<vmem>>, vector<128x512xbf16>
    %cst = arith.constant dense<0.000000e+00> : vector<8x512xf32>
    %3 = tpu.matmul %1, %2, %cst {dimension_numbers = #tpu.dot_dimension_numbers<[1], [0], [0], [1], [0, 0, 1, 1], [], []>} : vector<8x128xbf16>, vector<128x512xbf16>, vector<8x512xf32> -> vector<8x512xf32>
    %c0_3 = arith.constant 0 : index
    %c0_4 = arith.constant 0 : index
    %4 = vector.load %arg3[%c0_3, %c0_4] : memref<1x512xf32, #tpu.memory_space<vmem>>, vector<1x512xf32>
    %5 = vector.broadcast %4 : vector<1x512xf32> to vector<8x512xf32>
    %6 = arith.addf %3, %5 : vector<8x512xf32>
    %cst_5 = arith.constant 0.000000e+00 : f32
    %7 = vector.broadcast %cst_5 : f32 to vector<8x512xf32>
    %8 = arith.maximumf %6, %7 : vector<8x512xf32>
    %9 = arith.truncf %8 : vector<8x512xf32> to vector<8x512xbf16>
    %c0_6 = arith.constant 0 : index
    %c0_7 = arith.constant 0 : index
    %10 = vector.load %arg4[%c0_6, %c0_7] : memref<512x512xbf16, #tpu.memory_space<vmem>>, vector<512x512xbf16>
    %cst_8 = arith.constant dense<0.000000e+00> : vector<8x512xf32>
    %11 = tpu.matmul %9, %10, %cst_8 {dimension_numbers = #tpu.dot_dimension_numbers<[1], [0], [0], [1], [0, 0, 1, 1], [], []>} : vector<8x512xbf16>, vector<512x512xbf16>, vector<8x512xf32> -> vector<8x512xf32>
    %c0_9 = arith.constant 0 : index
    %c0_10 = arith.constant 0 : index
    %12 = vector.load %arg5[%c0_9, %c0_10] : memref<1x512xf32, #tpu.memory_space<vmem>>, vector<1x512xf32>
    %13 = vector.broadcast %12 : vector<1x512xf32> to vector<8x512xf32>
    %14 = arith.addf %11, %13 : vector<8x512xf32>
    %cst_11 = arith.constant 0.000000e+00 : f32
    %15 = vector.broadcast %cst_11 : f32 to vector<8x512xf32>
    %16 = arith.maximumf %14, %15 : vector<8x512xf32>
    %17 = arith.truncf %16 : vector<8x512xf32> to vector<8x512xbf16>
    %c0_12 = arith.constant 0 : index
    %c0_13 = arith.constant 0 : index
    %18 = vector.load %arg6[%c0_12, %c0_13] : memref<512x128xbf16, #tpu.memory_space<vmem>>, vector<512x128xbf16>
    %cst_14 = arith.constant dense<0.000000e+00> : vector<8x128xf32>
    %19 = tpu.matmul %17, %18, %cst_14 {dimension_numbers = #tpu.dot_dimension_numbers<[1], [0], [0], [1], [0, 0, 1, 1], [], []>} : vector<8x512xbf16>, vector<512x128xbf16>, vector<8x128xf32> -> vector<8x128xf32>
    %c0_15 = arith.constant 0 : index
    %c0_16 = arith.constant 0 : index
    %20 = vector.load %arg7[%c0_15, %c0_16] : memref<1x128xf32, #tpu.memory_space<vmem>>, vector<1x128xf32>
    %21 = vector.broadcast %20 : vector<1x128xf32> to vector<8x128xf32>
    %22 = arith.addf %19, %21 : vector<8x128xf32>
    %c0_17 = arith.constant 0 : index
    %c0_18 = arith.constant 0 : index
    %23 = vector.load %arg8[%c0_17, %c0_18] : memref<8x128xf32, #tpu.memory_space<vmem>>, vector<8x128xf32>
    tpu.vector_store %arg8[%c0_17, %c0_18], %22 {strides = array<i32>} : memref<8x128xf32, #tpu.memory_space<vmem>>, vector<8x128xf32>,
    return
  }
  func.func @transform_0(%arg0: i32) -> (i32, i32) {
    %c0_i32 = arith.constant 0 : i32
    %c0_i32_0 = arith.constant 0 : i32
    return %arg0, %c0_i32 : i32, i32
  }
  func.func @transform_1(%arg0: i32) -> (i32, i32) {
    %c0_i32 = arith.constant 0 : i32
    %c0_i32_0 = arith.constant 0 : i32
    %c0_i32_1 = arith.constant 0 : i32
    return %c0_i32, %c0_i32_0 : i32, i32
  }
  func.func @transform_2(%arg0: i32) -> (i32, i32) {
    %c0_i32 = arith.constant 0 : i32
    %c0_i32_0 = arith.constant 0 : i32
    %c0_i32_1 = arith.constant 0 : i32
    return %c0_i32, %c0_i32_0 : i32, i32
  }
  func.func @transform_3(%arg0: i32) -> (i32, i32) {
    %c0_i32 = arith.constant 0 : i32
    %c0_i32_0 = arith.constant 0 : i32
    %c0_i32_1 = arith.constant 0 : i32
    return %c0_i32, %c0_i32_0 : i32, i32
  }
  func.func @transform_4(%arg0: i32) -> (i32, i32) {
    %c0_i32 = arith.constant 0 : i32
    %c0_i32_0 = arith.constant 0 : i32
    %c0_i32_1 = arith.constant 0 : i32
    return %c0_i32, %c0_i32_0 : i32, i32
  }
  func.func @transform_5(%arg0: i32) -> (i32, i32) {
    %c0_i32 = arith.constant 0 : i32
    %c0_i32_0 = arith.constant 0 : i32
    %c0_i32_1 = arith.constant 0 : i32
    return %c0_i32, %c0_i32_0 : i32, i32
  }
  func.func @transform_6(%arg0: i32) -> (i32, i32) {
    %c0_i32 = arith.constant 0 : i32
    %c0_i32_0 = arith.constant 0 : i32
    %c0_i32_1 = arith.constant 0 : i32
    return %c0_i32, %c0_i32_0 : i32, i32
  }
  func.func @transform_7(%arg0: i32) -> (i32, i32) {
    %c0_i32 = arith.constant 0 : i32
    %c0_i32_0 = arith.constant 0 : i32
    return %arg0, %c0_i32 : i32, i32
  }
}

module attributes {stable_mosaic.version = 11 : i64} {
  func.func @dqn_kernel(%arg0: i32, %arg1: memref<8x128xf32, #tpu.memory_space<vmem>>, %arg2: memref<128x512xbf16, #tpu.memory_space<vmem>>, %arg3: memref<1x512xf32, #tpu.memory_space<vmem>>, %arg4: memref<512x512xbf16, #tpu.memory_space<vmem>>, %arg5: memref<1x512xf32, #tpu.memory_space<vmem>>, %arg6: memref<512x128xbf16, #tpu.memory_space<vmem>>, %arg7: memref<1x128xf32, #tpu.memory_space<vmem>>, %arg8: memref<8x128xf32, #tpu.memory_space<vmem>>) attributes {dimension_semantics = [#tpu.dimension_semantics<parallel>], iteration_bounds = array<i64: 1>, scalar_prefetch = 0 : i64, scratch_operands = 0 : i64, tpu.core_type = #tpu.core_type<tc>, window_params = [{transform_indices = @transform_0, window_bounds = array<i64: 8, 128>}, {pipeline_mode = #tpu.pipeline_mode<synchronous>, transform_indices = @transform_1, window_bounds = array<i64: 128, 512>}, {pipeline_mode = #tpu.pipeline_mode<synchronous>, transform_indices = @transform_2, window_bounds = array<i64: 1, 512>}, {pipeline_mode = #tpu.pipeline_mode<synchronous>, transform_indices = @transform_3, window_bounds = array<i64: 512, 512>}, {pipeline_mode = #tpu.pipeline_mode<synchronous>, transform_indices = @transform_4, window_bounds = array<i64: 1, 512>}, {pipeline_mode = #tpu.pipeline_mode<synchronous>, transform_indices = @transform_5, window_bounds = array<i64: 512, 128>}, {pipeline_mode = #tpu.pipeline_mode<synchronous>, transform_indices = @transform_6, window_bounds = array<i64: 1, 128>}, {transform_indices = @transform_7, window_bounds = array<i64: 8, 128>}]} {
    %c0 = arith.constant 0 : index
    %c0_0 = arith.constant 0 : index
    %0 = vector.load %arg1[%c0, %c0_0] : memref<8x128xf32, #tpu.memory_space<vmem>>, vector<8x128xf32>
    %1 = arith.truncf %0 : vector<8x128xf32> to vector<8x128xbf16>
    %c0_1 = arith.constant 0 : index
    %c0_2 = arith.constant 0 : index
    %2 = vector.load %arg2[%c0_1, %c0_2] : memref<128x512xbf16, #tpu.memory_space<vmem>>, vector<128x512xbf16>
    %cst = arith.constant dense<0.000000e+00> : vector<8x512xf32>
    %3 = tpu.matmul %1, %2, %cst {dimension_numbers = #tpu.dot_dimension_numbers<[1], [0], [0], [1], [0, 0, 1, 1], [], []>} : vector<8x128xbf16>, vector<128x512xbf16>, vector<8x512xf32> -> vector<8x512xf32>
    %c0_3 = arith.constant 0 : index
    %c0_4 = arith.constant 0 : index
    %4 = vector.load %arg3[%c0_3, %c0_4] : memref<1x512xf32, #tpu.memory_space<vmem>>, vector<1x512xf32>
    %5 = vector.broadcast %4 : vector<1x512xf32> to vector<8x512xf32>
    %6 = arith.addf %3, %5 : vector<8x512xf32>
    %cst_5 = arith.constant 0.000000e+00 : f32
    %7 = vector.broadcast %cst_5 : f32 to vector<8x512xf32>
    %8 = arith.maximumf %6, %7 : vector<8x512xf32>
    %9 = arith.truncf %8 : vector<8x512xf32> to vector<8x512xbf16>
    %c0_6 = arith.constant 0 : index
    %c0_7 = arith.constant 0 : index
    %10 = vector.load %arg4[%c0_6, %c0_7] : memref<512x512xbf16, #tpu.memory_space<vmem>>, vector<512x512xbf16>
    %cst_8 = arith.constant dense<0.000000e+00> : vector<8x512xf32>
    %11 = tpu.matmul %9, %10, %cst_8 {dimension_numbers = #tpu.dot_dimension_numbers<[1], [0], [0], [1], [0, 0, 1, 1], [], []>} : vector<8x512xbf16>, vector<512x512xbf16>, vector<8x512xf32> -> vector<8x512xf32>
    %c0_9 = arith.constant 0 : index
    %c0_10 = arith.constant 0 : index
    %12 = vector.load %arg5[%c0_9, %c0_10] : memref<1x512xf32, #tpu.memory_space<vmem>>, vector<1x512xf32>
    %13 = vector.broadcast %12 : vector<1x512xf32> to vector<8x512xf32>
    %14 = arith.addf %11, %13 : vector<8x512xf32>
    %cst_11 = arith.constant 0.000000e+00 : f32
    %15 = vector.broadcast %cst_11 : f32 to vector<8x512xf32>
    %16 = arith.maximumf %14, %15 : vector<8x512xf32>
    %17 = arith.truncf %16 : vector<8x512xf32> to vector<8x512xbf16>
    %c0_12 = arith.constant 0 : index
    %c0_13 = arith.constant 0 : index
    %18 = vector.load %arg6[%c0_12, %c0_13] : memref<512x128xbf16, #tpu.memory_space<vmem>>, vector<512x128xbf16>
    %cst_14 = arith.constant dense<0.000000e+00> : vector<8x128xf32>
    %19 = tpu.matmul %17, %18, %cst_14 {dimension_numbers = #tpu.dot_dimension_numbers<[1], [0], [0], [1], [0, 0, 1, 1], [], []>} : vector<8x512xbf16>, vector<512x128xbf16>, vector<8x128xf32> -> vector<8x128xf32>
    %c0_15 = arith.constant 0 : index
    %c0_16 = arith.constant 0 : index
    %20 = vector.load %arg7[%c0_15, %c0_16] : memref<1x128xf32, #tpu.memory_space<vmem>>, vector<1x128xf32>
    %21 = vector.broadcast %20 : vector<1x128xf32> to vector<8x128xf32>
    %22 = arith.addf %19, %21 : vector<8x128xf32>
    %c0_17 = arith.constant 0 : index
    %c0_18 = arith.constant 0 : index
    %23 = vector.load %arg8[%c0_17, %c0_18] : memref<8x128xf32, #tpu.memory_space<vmem>>, vector<8x128xf32>
    tpu.vector_store %arg8[%c0_17, %c0_18], %22 {strides = array<i32>} : memref<8x128xf32, #tpu.memory_space<vmem>>, vector<8x128xf32>,
    return
  }
  func.func @transform_0(%arg0: i32) -> (i32, i32) {
    %c0_i32 = arith.constant 0 : i32
    %c0_i32_0 = arith.constant 0 : i32
    return %arg0, %c0_i32 : i32, i32
  }
  func.func @transform_1(%arg0: i32) -> (i32, i32) {
    %c0_i32 = arith.constant 0 : i32
    %c0_i32_0 = arith.constant 0 : i32
    %c0_i32_1 = arith.constant 0 : i32
    return %c0_i32, %c0_i32_0 : i32, i32
  }
  func.func @transform_2(%arg0: i32) -> (i32, i32) {
    %c0_i32 = arith.constant 0 : i32
    %c0_i32_0 = arith.constant 0 : i32
    %c0_i32_1 = arith.constant 0 : i32
    return %c0_i32, %c0_i32_0 : i32, i32
  }
  func.func @transform_3(%arg0: i32) -> (i32, i32) {
    %c0_i32 = arith.constant 0 : i32
    %c0_i32_0 = arith.constant 0 : i32
    %c0_i32_1 = arith.constant 0 : i32
    return %c0_i32, %c0_i32_0 : i32, i32
  }
  func.func @transform_4(%arg0: i32) -> (i32, i32) {
    %c0_i32 = arith.constant 0 : i32
    %c0_i32_0 = arith.constant 0 : i32
    %c0_i32_1 = arith.constant 0 : i32
    return %c0_i32, %c0_i32_0 : i32, i32
  }
  func.func @transform_5(%arg0: i32) -> (i32, i32) {
    %c0_i32 = arith.constant 0 : i32
    %c0_i32_0 = arith.constant 0 : i32
    %c0_i32_1 = arith.constant 0 : i32
    return %c0_i32, %c0_i32_0 : i32, i32
  }
  func.func @transform_6(%arg0: i32) -> (i32, i32) {
    %c0_i32 = arith.constant 0 : i32
    %c0_i32_0 = arith.constant 0 : i32
    %c0_i32_1 = arith.constant 0 : i32
    return %c0_i32, %c0_i32_0 : i32, i32
  }
  func.func @transform_7(%arg0: i32) -> (i32, i32) {
    %c0_i32 = arith.constant 0 : i32
    %c0_i32_0 = arith.constant 0 : i32
    return %arg0, %c0_i32 : i32, i32
  }
}

</mosaic_0001>

<bundles_post_ra>
// kernel: tpu_custom_call.1
= control target key start
LH: loop header
LB: loop body
LE: loop exit
PB: predicated region body
PF: predicated region fallthrough
CT: control target
= control target key end

     0   :  { %12 = vsyncpa [#allocation3], 0  ;;  %s2474_s0 = inlined_call_operand.hbm [shape: f32[8,128], index: 0, kind: input, shape index: {}]   ;;  %s2475_s1 = inlined_call_operand.hbm [shape: bf16[128,512], index: 1, kind: input, shape index: {}]   ;;  %s2476_s2 = inlined_call_operand.hbm [shape: f32[1,512], index: 2, kind: input, shape index: {}]   ;;  %s2477_s3 = inlined_call_operand.hbm [shape: bf16[512,512], index: 3, kind: input, shape index: {}]   ;;  %s2478_s4 = inlined_call_operand.vmem [shape: f32[1,512], index: 4, kind: input, shape index: {}]   ;;  %s2479_s5 = inlined_call_operand.hbm [shape: bf16[512,128], index: 5, kind: input, shape index: {}]   ;;  %s2480_s6 = inlined_call_operand.vmem [shape: f32[1,128], index: 6, kind: input, shape index: {}]   ;;  %s2481_s7 = inlined_call_operand.hbm [shape: f32[8,128], index: 7, kind: output, shape index: {}]  }
   0x1   :  { %13 = vsyncpa [#allocation6], 0 }
   0x2   :  { %14 = vsyncpa [#allocation9], 0 }
   0x3   :  { %15 = vsyncpa [#allocation4], 0  ;;  %s2369_s24 = smov [#allocation5]  }
   0x4   :  { %s31_s25 = sshll.u32 %s2369_s24, 4  ;;  %s32_s25 = int_to_ptr.vmem [resolvable:$true] %s31_s25 }
   0x5   :  { %s2249_s26 = scalar_lea.vmem %s32_s25, 4096  ;;  %p2254_p1 = scmp.lt.s32.totalorder %s32_s25, %s32_s25 }
   0x6   :  { %p2250_p0 = scmp.ne.s32.totalorder %s32_s25, %s2249_s26  ;;  %p2255_p2 = scmp.lt.s32.totalorder %s2249_s26, %s2249_s26 }
   0x8   :  { %p2256_p3 = por %p2255_p2, %p2254_p1 }
   0xa   :  { %p2257_p4 = pnand %p2256_p3, %p2250_p0 }
   0xc   :  { %2260 = shalt.err (!%p2257_p4)
}
   0xd   :  { %s2370_s27 = smov 256   ;;  %s2371_s28 = smov 16  }
   0xe   :  { %37 = dma.hbm_to_vmem [thread:$0]  %s2475_s1, 4096, %s32_s25, [#allocation6], %s2370_s27, %s2370_s27, %s2371_s28  }
   0xf   :  { %s2372_s8 = smov [#allocation8]   ;;  %s2373_s10 = smov [#allocation2]  }
  0x10   :  { %s53_s9 = sshll.u32 %s2372_s8, 4  ;;  %s22_s11 = sshll.u32 %s2373_s10, 4  ;;  %s54_s9 = int_to_ptr.vmem [resolvable:$true] %s53_s9  ;;  %s23_s11 = int_to_ptr.vmem [resolvable:$true] %s22_s11 }
  0x11   :  { %s2269_s12 = scalar_lea.vmem %s54_s9, 16384  ;;  %p2274_p6 = scmp.lt.s32.totalorder %s54_s9, %s54_s9 }
  0x12   :  { %p2270_p5 = scmp.ne.s32.totalorder %s54_s9, %s2269_s12  ;;  %p2275_p7 = scmp.lt.s32.totalorder %s2269_s12, %s2269_s12 }
  0x14   :  { %p2276_p8 = por %p2275_p7, %p2274_p6 }
  0x16   :  { %p2277_p9 = pnand %p2276_p8, %p2270_p5 }
  0x18   :  { %2280 = shalt.err (!%p2277_p9)
}
  0x19   :  { %59 = dma.hbm_to_vmem [thread:$0]  %s2477_s3, 16384, %s54_s9, [#allocation9], %s2370_s27, %s2370_s27, %s2371_s28  }
  0x1a   :  { %s2289_s15 = scalar_lea.vmem %s23_s11, 128  ;;  %p2294_p11 = scmp.lt.s32.totalorder %s23_s11, %s23_s11 }
  0x1b   :  { %p2290_p10 = scmp.ne.s32.totalorder %s23_s11, %s2289_s15  ;;  %p2295_p12 = scmp.lt.s32.totalorder %s2289_s15, %s2289_s15 }
  0x1d   :  { %p2296_p13 = por %p2295_p12, %p2294_p11 }
  0x1f   :  { %p2297_p0 = pnand %p2296_p13, %p2290_p10 }
  0x21   :  { %2300 = shalt.err (!%p2297_p0)
}
  0x22   :  { %25 = dma.hbm_to_vmem [thread:$0]  %s2474_s0, 128, %s23_s11, [#allocation3]  }
  0x23   :  { %s2374_s17 = smov [#allocation7]   ;;  %s2375_s19 = smov [#allocation10]  }
  0x24   :  { %s44_s18 = sshll.u32 %s2374_s17, 4  ;;  %s67_s20 = sshll.u32 %s2375_s19, 4  ;;  %s45_s18 = int_to_ptr.vmem [resolvable:$true] %s44_s18  ;;  %s68_s20 = int_to_ptr.vmem [resolvable:$true] %s67_s20 }
  0x25   :  { %s2309_s21 = scalar_lea.vmem %s45_s18, 64  ;;  %p2314_p2 = scmp.lt.s32.totalorder %s45_s18, %s45_s18 }
  0x26   :  { %p2310_p1 = scmp.ne.s32.totalorder %s45_s18, %s2309_s21  ;;  %p2315_p3 = scmp.lt.s32.totalorder %s2309_s21, %s2309_s21 }
  0x28   :  { %p2316_p4 = por %p2315_p3, %p2314_p2 }
  0x2a   :  { %p2317_p5 = pnand %p2316_p4, %p2310_p1 }
  0x2c   :  { %2320 = shalt.err (!%p2317_p5)
}
  0x2d   :  { %47 = dma.hbm_to_vmem [thread:$0]  %s2476_s2, 64, %s45_s18, [#allocation6]  }
  0x2e   :  { %s2329_s23 = scalar_lea.vmem %s68_s20, 4096  ;;  %p2334_p7 = scmp.lt.s32.totalorder %s68_s20, %s68_s20 }
  0x2f   :  { %p2330_p6 = scmp.ne.s32.totalorder %s68_s20, %s2329_s23  ;;  %p2335_p8 = scmp.lt.s32.totalorder %s2329_s23, %s2329_s23 }
  0x31   :  { %p2336_p9 = por %p2335_p8, %p2334_p7 }
  0x33   :  { %p2337_p10 = pnand %p2336_p9, %p2330_p6 }
  0x35   :  { %2340 = shalt.err (!%p2337_p10)
}
  0x36   :  { %s2376_s0 = smov 64   ;;  %s2377_s24 = smov 4  }
  0x37   :  { %73 = dma.hbm_to_vmem [thread:$0]  %s2479_s5, 4096, %s68_s20, [#allocation9], %s2376_s0, %s2376_s0, %s2377_s24  }
  0x38   :  { %2361 = dma.done.wait [#allocation3], 128  }
  0x39   :  { %2362 = vsyncadd [#allocation3], 4294967168 }
  0x3a   :  { %2363 = dma.done.wait [#allocation6], 4160  }
  0x3b   :  { %2364 = vsyncadd [#allocation6], 4294963136 }
  0x3c   :  { %2365 = dma.done.wait [#allocation9], 20480  }
  0x3d   :  { %2366 = vsyncadd [#allocation9], 4294946816  ;;  %v2378_v0 = vmov 0   ;;  %v1969_v1 = vld [vmem:[#allocation5 + $0xe4] ss:$16 sps:$4 sm:$0xff]   ;;  %v92_v33 = vld [vmem:[#allocation2] sm:$0xff] }
  0x3e   :  { %340 = vmatprep.mubr.bf16.mxu0 %v2378_v0  ;;  %381 = vmatprep.mubr.bf16.mxu1 %v2378_v0  ;;  %v1971_v2 = vld [vmem:[#allocation5 + $0xec] ss:$16 sps:$4 sm:$0xff]   ;;  %v1973_v3 = vld [vmem:[#allocation5 + $0xe0] ss:$16 sps:$4 sm:$0xff]   ;;  %v1974_v4 = vld [vmem:[#allocation5 + $0xe8] ss:$16 sps:$4 sm:$0xff]   ;;  %v93_v36 = vpack.c.bf16 %v92_v33, %v92_v33 }
  0x3f   :  { %308 = vmatprep.subr.bf16.mxu0 %v1969_v1  ;;  %349 = vmatprep.subr.bf16.mxu1 %v1971_v2  ;;  %v1975_v5 = vld [vmem:[#allocation5 + $0xc4] ss:$16 sps:$4 sm:$0xff]   ;;  %v1977_v6 = vld [vmem:[#allocation5 + $0xcc] ss:$16 sps:$4 sm:$0xff]   ;;  %v1979_v7 = vld [vmem:[#allocation5 + $0xc0] ss:$16 sps:$4 sm:$0xff]  }
  0x40   :  { %309 = vmatpush1.bf16.msra.mxu0 %v1973_v3  ;;  %350 = vmatpush1.bf16.msra.mxu1 %v1974_v4  ;;  %v1980_v8 = vld [vmem:[#allocation5 + $0xc8] ss:$16 sps:$4 sm:$0xff]   ;;  %v1981_v9 = vld [vmem:[#allocation5 + $0xa4] ss:$16 sps:$4 sm:$0xff]   ;;  %v1983_v10 = vld [vmem:[#allocation5 + $0xac] ss:$16 sps:$4 sm:$0xff]  }
  0x41   :  { %310 = vmatprep.subr.bf16.mxu0 %v1975_v5  ;;  %351 = vmatprep.subr.bf16.mxu1 %v1977_v6  ;;  %v1985_v11 = vld [vmem:[#allocation5 + $0xa0] ss:$16 sps:$4 sm:$0xff]   ;;  %v1986_v12 = vld [vmem:[#allocation5 + $0xa8] ss:$16 sps:$4 sm:$0xff]   ;;  %v1987_v13 = vld [vmem:[#allocation5 + $0x84] ss:$16 sps:$4 sm:$0xff]  }
  0x42   :  { %v1989_v14 = vld [vmem:[#allocation5 + $0x8c] ss:$16 sps:$4 sm:$0xff]   ;;  %v1991_v15 = vld [vmem:[#allocation5 + $0x80] ss:$16 sps:$4 sm:$0xff]   ;;  %v1992_v16 = vld [vmem:[#allocation5 + $0x88] ss:$16 sps:$4 sm:$0xff]  }
  0x43   :  { %v1993_v17 = vld [vmem:[#allocation5 + $0x64] ss:$16 sps:$4 sm:$0xff]   ;;  %v1995_v18 = vld [vmem:[#allocation5 + $0x6c] ss:$16 sps:$4 sm:$0xff]   ;;  %v1997_v19 = vld [vmem:[#allocation5 + $0x60] ss:$16 sps:$4 sm:$0xff]  }
  0x44   :  { %311 = vmatpush1.bf16.msra.mxu0 %v1979_v7  ;;  %352 = vmatpush1.bf16.msra.mxu1 %v1980_v8  ;;  %v1998_v20 = vld [vmem:[#allocation5 + $0x68] ss:$16 sps:$4 sm:$0xff]   ;;  %v1999_v21 = vld [vmem:[#allocation5 + $0x44] ss:$16 sps:$4 sm:$0xff]   ;;  %v2001_v22 = vld [vmem:[#allocation5 + $0x4c] ss:$16 sps:$4 sm:$0xff]  }
  0x45   :  { %312 = vmatprep.subr.bf16.mxu0 %v1981_v9  ;;  %353 = vmatprep.subr.bf16.mxu1 %v1983_v10  ;;  %v2003_v23 = vld [vmem:[#allocation5 + $0x40] ss:$16 sps:$4 sm:$0xff]   ;;  %v2004_v24 = vld [vmem:[#allocation5 + $0x48] ss:$16 sps:$4 sm:$0xff]   ;;  %v2005_v25 = vld [vmem:[#allocation5 + $0x24] ss:$16 sps:$4 sm:$0xff]  }
  0x46   :  { %v2007_v26 = vld [vmem:[#allocation5 + $0x2c] ss:$16 sps:$4 sm:$0xff]   ;;  %v2009_v27 = vld [vmem:[#allocation5 + $0x20] ss:$16 sps:$4 sm:$0xff]   ;;  %v2010_v28 = vld [vmem:[#allocation5 + $0x28] ss:$16 sps:$4 sm:$0xff]  }
  0x47   :  { %v2011_v29 = vld [vmem:[#allocation5 + $0x4] ss:$16 sps:$4 sm:$0xff]   ;;  %v2013_v30 = vld [vmem:[#allocation5 + $0xc] ss:$16 sps:$4 sm:$0xff]   ;;  %v2015_v31 = vld [vmem:[#allocation5] ss:$16 sps:$4 sm:$0xff]  }
  0x48   :  { %313 = vmatpush1.bf16.msra.mxu0 %v1985_v11  ;;  %354 = vmatpush1.bf16.msra.mxu1 %v1986_v12  ;;  %v2016_v32 = vld [vmem:[#allocation5 + $0x8] ss:$16 sps:$4 sm:$0xff]   ;;  %v2017_v37 = vld [vmem:[#allocation8 + $0xe0] ss:$16 sps:$4 sm:$0xff]   ;;  %s2379_s28 = smov [#allocation11]  }
  0x49   :  { %314 = vmatprep.subr.bf16.mxu0 %v1987_v13  ;;  %355 = vmatprep.subr.bf16.mxu1 %v1989_v14  ;;  %v2019_v34 = vld [vmem:[#allocation8 + $0xe4] ss:$16 sps:$4 sm:$0xff]   ;;  %v2020_v38 = vld [vmem:[#allocation8 + $0x2e0] ss:$16 sps:$4 sm:$0xff]   ;;  %s1710_s29 = sshll.u32 %s2379_s28, 4  ;;  %s1711_s29 = int_to_ptr.vmem [resolvable:$true] %s1710_s29 }
  0x4a   :  { %v2022_v35 = vld [vmem:[#allocation8 + $0x2e4] ss:$16 sps:$4 sm:$0xff]   ;;  %v2023_v41 = vld [vmem:[#allocation8 + $0xc0] ss:$16 sps:$4 sm:$0xff]   ;;  %s2341_s30 = scalar_lea.vmem %s1711_s29, 128  ;;  %p2346_p12 = scmp.lt.s32.totalorder %s1711_s29, %s1711_s29 }
  0x4b   :  { %v2025_v39 = vld [vmem:[#allocation8 + $0xc4] ss:$16 sps:$4 sm:$0xff]   ;;  %v2026_v42 = vld [vmem:[#allocation8 + $0x2c0] ss:$16 sps:$4 sm:$0xff]   ;;  %p2342_p11 = scmp.ne.s32.totalorder %s1711_s29, %s2341_s30  ;;  %p2347_p13 = scmp.lt.s32.totalorder %s2341_s30, %s2341_s30 }
  0x4c   :  { %315 = vmatpush1.bf16.msra.mxu0 %v1991_v15  ;;  %356 = vmatpush1.bf16.msra.mxu1 %v1992_v16  ;;  %v2028_v40 = vld [vmem:[#allocation8 + $0x2c4] ss:$16 sps:$4 sm:$0xff]   ;;  %v2029_v45 = vld [vmem:[#allocation8 + $0xa0] ss:$16 sps:$4 sm:$0xff]  }
  0x4d   :  { %316 = vmatprep.subr.bf16.mxu0 %v1993_v17  ;;  %357 = vmatprep.subr.bf16.mxu1 %v1995_v18  ;;  %v2031_v43 = vld [vmem:[#allocation8 + $0xa4] ss:$16 sps:$4 sm:$0xff]   ;;  %v2032_v46 = vld [vmem:[#allocation8 + $0x2a0] ss:$16 sps:$4 sm:$0xff]   ;;  %p2348_p0 = por %p2347_p13, %p2346_p12 }
  0x4e   :  { %v2034_v44 = vld [vmem:[#allocation8 + $0x2a4] ss:$16 sps:$4 sm:$0xff]   ;;  %v2035_v49 = vld [vmem:[#allocation8 + $0x80] ss:$16 sps:$4 sm:$0xff]  }
  0x4f   :  { %v2037_v47 = vld [vmem:[#allocation8 + $0x84] ss:$16 sps:$4 sm:$0xff]   ;;  %v2038_v50 = vld [vmem:[#allocation8 + $0x280] ss:$16 sps:$4 sm:$0xff]   ;;  %p2349_p1 = pnand %p2348_p0, %p2342_p11 }
  0x50   :  { %317 = vmatpush1.bf16.msra.mxu0 %v1997_v19  ;;  %358 = vmatpush1.bf16.msra.mxu1 %v1998_v20  ;;  %v2040_v48 = vld [vmem:[#allocation8 + $0x284] ss:$16 sps:$4 sm:$0xff]   ;;  %v2041_v53 = vld [vmem:[#allocation8 + $0x60] ss:$16 sps:$4 sm:$0xff]  }
  0x51   :  { %318 = vmatprep.subr.bf16.mxu0 %v1999_v21  ;;  %359 = vmatprep.subr.bf16.mxu1 %v2001_v22  ;;  %v2043_v51 = vld [vmem:[#allocation8 + $0x64] ss:$16 sps:$4 sm:$0xff]   ;;  %v2044_v54 = vld [vmem:[#allocation8 + $0x260] ss:$16 sps:$4 sm:$0xff]  }
  0x52   :  { %v2046_v52 = vld [vmem:[#allocation8 + $0x264] ss:$16 sps:$4 sm:$0xff]   ;;  %v2047_v57 = vld [vmem:[#allocation8 + $0x40] ss:$16 sps:$4 sm:$0xff]  }
  0x53   :  { %v2049_v55 = vld [vmem:[#allocation8 + $0x44] ss:$16 sps:$4 sm:$0xff]   ;;  %v2050_v58 = vld [vmem:[#allocation8 + $0x240] ss:$16 sps:$4 sm:$0xff]  }
  0x54   :  { %319 = vmatpush1.bf16.msra.mxu0 %v2003_v23  ;;  %360 = vmatpush1.bf16.msra.mxu1 %v2004_v24  ;;  %v2052_v56 = vld [vmem:[#allocation8 + $0x244] ss:$16 sps:$4 sm:$0xff]   ;;  %v2053_v61 = vld [vmem:[#allocation8 + $0x20] ss:$16 sps:$4 sm:$0xff]  }
  0x55   :  { %320 = vmatprep.subr.bf16.mxu0 %v2005_v25  ;;  %361 = vmatprep.subr.bf16.mxu1 %v2007_v26  ;;  %v2055_v59 = vld [vmem:[#allocation8 + $0x24] ss:$16 sps:$4 sm:$0xff]   ;;  %v2056_v62 = vld [vmem:[#allocation8 + $0x220] ss:$16 sps:$4 sm:$0xff]  }
  0x56   :  { %v2058_v60 = vld [vmem:[#allocation8 + $0x224] ss:$16 sps:$4 sm:$0xff]   ;;  %v2059_v1 = vld [vmem:[#allocation8] ss:$16 sps:$4 sm:$0xff]  }
  0x57   :  { %v2061_v63 = vld [vmem:[#allocation8 + $0x4] ss:$16 sps:$4 sm:$0xff]   ;;  %v2062_v2 = vld [vmem:[#allocation8 + $0x200] ss:$16 sps:$4 sm:$0xff]  }
  0x58   :  { %321 = vmatpush1.bf16.msra.mxu0 %v2009_v27  ;;  %362 = vmatpush1.bf16.msra.mxu1 %v2010_v28  ;;  %v2064_v0 = vld [vmem:[#allocation8 + $0x204] ss:$16 sps:$4 sm:$0xff]   ;;  %v2065_v5 = vld [vmem:[#allocation8 + $0x1e0] ss:$16 sps:$4 sm:$0xff]  }
  0x59   :  { %322 = vmatprep.subr.bf16.mxu0 %v2011_v29  ;;  %363 = vmatprep.subr.bf16.mxu1 %v2013_v30  ;;  %v2067_v3 = vld [vmem:[#allocation8 + $0x1e4] ss:$16 sps:$4 sm:$0xff]   ;;  %v2068_v6 = vld [vmem:[#allocation8 + $0x3e0] ss:$16 sps:$4 sm:$0xff]  }
  0x5a   :  { %v2070_v4 = vld [vmem:[#allocation8 + $0x3e4] ss:$16 sps:$4 sm:$0xff]   ;;  %v2071_v9 = vld [vmem:[#allocation8 + $0x1c0] ss:$16 sps:$4 sm:$0xff]  }
  0x5b   :  { %v2073_v7 = vld [vmem:[#allocation8 + $0x1c4] ss:$16 sps:$4 sm:$0xff]   ;;  %v2074_v10 = vld [vmem:[#allocation8 + $0x3c0] ss:$16 sps:$4 sm:$0xff]  }
  0x5c   :  { %323 = vmatpush1.bf16.msra.mxu0 %v2015_v31  ;;  %364 = vmatpush1.bf16.msra.mxu1 %v2016_v32  ;;  %v2076_v8 = vld [vmem:[#allocation8 + $0x3c4] ss:$16 sps:$4 sm:$0xff]   ;;  %v2077_v13 = vld [vmem:[#allocation8 + $0x1a0] ss:$16 sps:$4 sm:$0xff]  }
  0x5d   :  { %1188 = vmatprep.subr.bf16.mxu0 %v2019_v34  ;;  %1229 = vmatprep.subr.bf16.mxu1 %v2022_v35  ;;  %v2079_v11 = vld [vmem:[#allocation8 + $0x1a4] ss:$16 sps:$4 sm:$0xff]   ;;  %v2080_v14 = vld [vmem:[#allocation8 + $0x3a0] ss:$16 sps:$4 sm:$0xff]   ;;  %v2115_v35 = vld [vmem:[#allocation8 + $0xec] ss:$16 sps:$4 sm:$0xff]  }
  0x5e   :  { %v2082_v12 = vld [vmem:[#allocation8 + $0x3a4] ss:$16 sps:$4 sm:$0xff]   ;;  %v2083_v17 = vld [vmem:[#allocation8 + $0x180] ss:$16 sps:$4 sm:$0xff]  }
  0x5f   :  { %341 = vmatmul.mubr.bf16.vlgmr.msra.gmra.mxu0 %v93_v36  ;;  %382 = vmatmul.mubr.bf16.vlgmr.msra.gmra.mxu1 %v93_v36  ;;  %v2085_v15 = vld [vmem:[#allocation8 + $0x184] ss:$16 sps:$4 sm:$0xff]   ;;  %v2086_v18 = vld [vmem:[#allocation8 + $0x380] ss:$16 sps:$4 sm:$0xff]   ;;  %v2118_v36 = vld [vmem:[#allocation8 + $0x2ec] ss:$16 sps:$4 sm:$0xff]  }
  0x60   :  { %1189 = vmatpush1.bf16.msra.mxu0 %v2017_v37  ;;  %1230 = vmatpush1.bf16.msra.mxu1 %v2020_v38  ;;  %v2088_v16 = vld [vmem:[#allocation8 + $0x384] ss:$16 sps:$4 sm:$0xff]   ;;  %v2089_v21 = vld [vmem:[#allocation8 + $0x160] ss:$16 sps:$4 sm:$0xff]   ;;  %v128_v37 = vlaneseq }
  0x61   :  { %1190 = vmatprep.subr.bf16.mxu0 %v2025_v39  ;;  %1231 = vmatprep.subr.bf16.mxu1 %v2028_v40  ;;  %v2091_v19 = vld [vmem:[#allocation8 + $0x164] ss:$16 sps:$4 sm:$0xff]   ;;  %v2092_v22 = vld [vmem:[#allocation8 + $0x360] ss:$16 sps:$4 sm:$0xff]  }
  0x62   :  { %v2094_v20 = vld [vmem:[#allocation8 + $0x364] ss:$16 sps:$4 sm:$0xff]   ;;  %v2095_v25 = vld [vmem:[#allocation8 + $0x140] ss:$16 sps:$4 sm:$0xff]   ;;  %v2435_v38 = vshrl.u32 %v128_v37, 7 }
  0x63   :  { %v2097_v23 = vld [vmem:[#allocation8 + $0x144] ss:$16 sps:$4 sm:$0xff]   ;;  %v2098_v26 = vld [vmem:[#allocation8 + $0x340] ss:$16 sps:$4 sm:$0xff]   ;;  %v2164_v37 = vld [vmem:[#allocation8 + $0x3e8] ss:$16 sps:$4 sm:$0xff]  }
  0x64   :  { %1191 = vmatpush1.bf16.msra.mxu0 %v2023_v41  ;;  %1232 = vmatpush1.bf16.msra.mxu1 %v2026_v42  ;;  %v2100_v24 = vld [vmem:[#allocation8 + $0x344] ss:$16 sps:$4 sm:$0xff]   ;;  %v2101_v29 = vld [vmem:[#allocation8 + $0x120] ss:$16 sps:$4 sm:$0xff]   ;;  %v130_v39 = vsub.s32 0, %v2435_v38  ;;  %v138_v40 = vsub.s32 2, %v2435_v38 }
  0x65   :  { %1192 = vmatprep.subr.bf16.mxu0 %v2031_v43  ;;  %1233 = vmatprep.subr.bf16.mxu1 %v2034_v44  ;;  %v2103_v27 = vld [vmem:[#allocation8 + $0x124] ss:$16 sps:$4 sm:$0xff]   ;;  %v2104_v30 = vld [vmem:[#allocation8 + $0x320] ss:$16 sps:$4 sm:$0xff]   ;;  %v126_v41 = vld [vmem:[#allocation7] sm:$0xf] }
  0x66   :  { %v2106_v28 = vld [vmem:[#allocation8 + $0x324] ss:$16 sps:$4 sm:$0xff]   ;;  %v2107_v33 = vld [vmem:[#allocation8 + $0x100] ss:$16 sps:$4 sm:$0xff]   ;;  %v134_v42 = vsub.s32 1, %v2435_v38  ;;  %v142_v43 = vsub.s32 3, %v2435_v38  ;;  %v131_v44 = vrot.slane %v126_v41, %v130_v39 }
  0x67   :  { %v2109_v31 = vld [vmem:[#allocation8 + $0x104] ss:$16 sps:$4 sm:$0xff]   ;;  %v2110_v34 = vld [vmem:[#allocation8 + $0x300] ss:$16 sps:$4 sm:$0xff]  }
  0x68   :  { %1193 = vmatpush1.bf16.msra.mxu0 %v2029_v45  ;;  %1234 = vmatpush1.bf16.msra.mxu1 %v2032_v46  ;;  %v2112_v32 = vld [vmem:[#allocation8 + $0x304] ss:$16 sps:$4 sm:$0xff]   ;;  %v139_v45 = vrot.slane %v126_v41, %v138_v40  ;;  %v135_v46 = vrot.slane %v126_v41, %v134_v42 }
  0x69   :  { %1194 = vmatprep.subr.bf16.mxu0 %v2037_v47  ;;  %1235 = vmatprep.subr.bf16.mxu1 %v2040_v48  ;;  %v143_v47 = vrot.slane %v126_v41, %v142_v43  ;;  %v2169_v41 = vld [vmem:[#allocation8 + $0x1cc] ss:$16 sps:$4 sm:$0xff]  }
  0x6c   :  { %1195 = vmatpush1.bf16.msra.mxu0 %v2035_v49  ;;  %1236 = vmatpush1.bf16.msra.mxu1 %v2038_v50 }
  0x6d   :  { %1196 = vmatprep.subr.bf16.mxu0 %v2043_v51  ;;  %1237 = vmatprep.subr.bf16.mxu1 %v2046_v52 }
  0x70   :  { %1197 = vmatpush1.bf16.msra.mxu0 %v2041_v53  ;;  %1238 = vmatpush1.bf16.msra.mxu1 %v2044_v54 }
  0x71   :  { %1198 = vmatprep.subr.bf16.mxu0 %v2049_v55  ;;  %1239 = vmatprep.subr.bf16.mxu1 %v2052_v56 }
  0x74   :  { %1199 = vmatpush1.bf16.msra.mxu0 %v2047_v57  ;;  %1240 = vmatpush1.bf16.msra.mxu1 %v2050_v58 }
  0x75   :  { %1200 = vmatprep.subr.bf16.mxu0 %v2055_v59  ;;  %1241 = vmatprep.subr.bf16.mxu1 %v2058_v60 }
  0x78   :  { %1201 = vmatpush1.bf16.msra.mxu0 %v2053_v61  ;;  %1242 = vmatpush1.bf16.msra.mxu1 %v2056_v62 }
  0x79   :  { %1202 = vmatprep.subr.bf16.mxu0 %v2061_v63  ;;  %1243 = vmatprep.subr.bf16.mxu1 %v2064_v0 }
  0x7c   :  { %1203 = vmatpush1.bf16.msra.mxu0 %v2059_v1  ;;  %1244 = vmatpush1.bf16.msra.mxu1 %v2062_v2 }
  0x7d   :  { %1204 = vmatprep.subr.bf16.mxu0 %v2067_v3  ;;  %1245 = vmatprep.subr.bf16.mxu1 %v2070_v4  ;;  %v2113_v3 = vld [vmem:[#allocation8 + $0xe8] ss:$16 sps:$4 sm:$0xff]  }
  0x7e   :  { %v2116_v4 = vld [vmem:[#allocation8 + $0x2e8] ss:$16 sps:$4 sm:$0xff]  }
  0x80   :  { %1205 = vmatpush2.bf16.msra.mxu0 %v2065_v5  ;;  %1246 = vmatpush2.bf16.msra.mxu1 %v2068_v6  ;;  %v2121_v6 = vld [vmem:[#allocation8 + $0xcc] ss:$16 sps:$4 sm:$0xff]  }
  0x81   :  { %1206 = vmatprep.subr.bf16.mxu0 %v2073_v7  ;;  %1247 = vmatprep.subr.bf16.mxu1 %v2076_v8  ;;  %v2124_v7 = vld [vmem:[#allocation8 + $0x2cc] ss:$16 sps:$4 sm:$0xff]   ;;  %v2119_v8 = vld [vmem:[#allocation8 + $0xc8] ss:$16 sps:$4 sm:$0xff]  }
  0x84   :  { %1207 = vmatpush2.bf16.msra.mxu0 %v2071_v9  ;;  %1248 = vmatpush2.bf16.msra.mxu1 %v2074_v10  ;;  %v2122_v9 = vld [vmem:[#allocation8 + $0x2c8] ss:$16 sps:$4 sm:$0xff]   ;;  %v2127_v10 = vld [vmem:[#allocation8 + $0xac] ss:$16 sps:$4 sm:$0xff]  }
  0x85   :  { %1208 = vmatprep.subr.bf16.mxu0 %v2079_v11  ;;  %1249 = vmatprep.subr.bf16.mxu1 %v2082_v12  ;;  %v2130_v11 = vld [vmem:[#allocation8 + $0x2ac] ss:$16 sps:$4 sm:$0xff]   ;;  %v2125_v12 = vld [vmem:[#allocation8 + $0xa8] ss:$16 sps:$4 sm:$0xff]  }
  0x88   :  { %1209 = vmatpush2.bf16.msra.mxu0 %v2077_v13  ;;  %1250 = vmatpush2.bf16.msra.mxu1 %v2080_v14  ;;  %v2128_v13 = vld [vmem:[#allocation8 + $0x2a8] ss:$16 sps:$4 sm:$0xff]   ;;  %v2133_v14 = vld [vmem:[#allocation8 + $0x8c] ss:$16 sps:$4 sm:$0xff]  }
  0x89   :  { %1210 = vmatprep.subr.bf16.mxu0 %v2085_v15  ;;  %1251 = vmatprep.subr.bf16.mxu1 %v2088_v16  ;;  %v2136_v15 = vld [vmem:[#allocation8 + $0x28c] ss:$16 sps:$4 sm:$0xff]   ;;  %v2131_v16 = vld [vmem:[#allocation8 + $0x88] ss:$16 sps:$4 sm:$0xff]  }
  0x8c   :  { %1211 = vmatpush2.bf16.msra.mxu0 %v2083_v17  ;;  %1252 = vmatpush2.bf16.msra.mxu1 %v2086_v18  ;;  %v2134_v17 = vld [vmem:[#allocation8 + $0x288] ss:$16 sps:$4 sm:$0xff]   ;;  %v2139_v18 = vld [vmem:[#allocation8 + $0x6c] ss:$16 sps:$4 sm:$0xff]  }
  0x8d   :  { %1212 = vmatprep.subr.bf16.mxu0 %v2091_v19  ;;  %1253 = vmatprep.subr.bf16.mxu1 %v2094_v20  ;;  %v2142_v19 = vld [vmem:[#allocation8 + $0x26c] ss:$16 sps:$4 sm:$0xff]   ;;  %v2137_v20 = vld [vmem:[#allocation8 + $0x68] ss:$16 sps:$4 sm:$0xff]  }
  0x90   :  { %1213 = vmatpush2.bf16.msra.mxu0 %v2089_v21  ;;  %1254 = vmatpush2.bf16.msra.mxu1 %v2092_v22  ;;  %v2140_v21 = vld [vmem:[#allocation8 + $0x268] ss:$16 sps:$4 sm:$0xff]   ;;  %v2145_v22 = vld [vmem:[#allocation8 + $0x4c] ss:$16 sps:$4 sm:$0xff]  }
  0x91   :  { %1214 = vmatprep.subr.bf16.mxu0 %v2097_v23  ;;  %1255 = vmatprep.subr.bf16.mxu1 %v2100_v24  ;;  %v2148_v23 = vld [vmem:[#allocation8 + $0x24c] ss:$16 sps:$4 sm:$0xff]   ;;  %v2143_v24 = vld [vmem:[#allocation8 + $0x48] ss:$16 sps:$4 sm:$0xff]  }
  0x94   :  { %1215 = vmatpush2.bf16.msra.mxu0 %v2095_v25  ;;  %1256 = vmatpush2.bf16.msra.mxu1 %v2098_v26  ;;  %v2146_v25 = vld [vmem:[#allocation8 + $0x248] ss:$16 sps:$4 sm:$0xff]   ;;  %v2151_v26 = vld [vmem:[#allocation8 + $0x2c] ss:$16 sps:$4 sm:$0xff]  }
  0x95   :  { %1216 = vmatprep.subr.bf16.mxu0 %v2103_v27  ;;  %1257 = vmatprep.subr.bf16.mxu1 %v2106_v28  ;;  %v2154_v27 = vld [vmem:[#allocation8 + $0x22c] ss:$16 sps:$4 sm:$0xff]   ;;  %v2149_v28 = vld [vmem:[#allocation8 + $0x28] ss:$16 sps:$4 sm:$0xff]  }
  0x98   :  { %1217 = vmatpush2.bf16.msra.mxu0 %v2101_v29  ;;  %1258 = vmatpush2.bf16.msra.mxu1 %v2104_v30  ;;  %v2152_v29 = vld [vmem:[#allocation8 + $0x228] ss:$16 sps:$4 sm:$0xff]   ;;  %v2157_v30 = vld [vmem:[#allocation8 + $0xc] ss:$16 sps:$4 sm:$0xff]  }
  0x99   :  { %1218 = vmatprep.subr.bf16.mxu0 %v2109_v31  ;;  %1259 = vmatprep.subr.bf16.mxu1 %v2112_v32  ;;  %v2160_v31 = vld [vmem:[#allocation8 + $0x20c] ss:$16 sps:$4 sm:$0xff]   ;;  %v2155_v32 = vld [vmem:[#allocation8 + $0x8] ss:$16 sps:$4 sm:$0xff]  }
  0x9c   :  { %1219 = vmatpush2.bf16.msra.mxu0 %v2107_v33  ;;  %1260 = vmatpush2.bf16.msra.mxu1 %v2110_v34  ;;  %v2158_v33 = vld [vmem:[#allocation8 + $0x208] ss:$16 sps:$4 sm:$0xff]   ;;  %v2163_v34 = vld [vmem:[#allocation8 + $0x1ec] ss:$16 sps:$4 sm:$0xff]  }
  0x9d   :  { %1270 = vmatprep.subr.bf16.mxu0 %v2115_v35  ;;  %1311 = vmatprep.subr.bf16.mxu1 %v2118_v36  ;;  %v2166_v35 = vld [vmem:[#allocation8 + $0x3ec] ss:$16 sps:$4 sm:$0xff]   ;;  %v2161_v36 = vld [vmem:[#allocation8 + $0x1e8] ss:$16 sps:$4 sm:$0xff]  }
 0x11f   :  { %v342_v48 = vpop.f32.mrf.mxu0  ;;  %v383_v49 = vpop.f32.mrf.mxu1 }
 0x120   :  { %v343_v50 = vadd.f32 %v342_v48, %v131_v44  ;;  %v384_v51 = vadd.f32 %v383_v49, %v139_v45  ;;  %v2172_v44 = vld [vmem:[#allocation8 + $0x3cc] ss:$16 sps:$4 sm:$0xff]   ;;  %v2167_v45 = vld [vmem:[#allocation8 + $0x1c8] ss:$16 sps:$4 sm:$0xff]  }
 0x121   :  { %v344_v52 = vpop.f32.mrf.mxu0  ;;  %v385_v53 = vpop.f32.mrf.mxu1  ;;  %v2178_v48 = vld [vmem:[#allocation8 + $0x3ac] ss:$16 sps:$4 sm:$0xff]   ;;  %v2173_v49 = vld [vmem:[#allocation8 + $0x1a8] ss:$16 sps:$4 sm:$0xff]  }
 0x122   :  { %v392_v54 = vmax.f32 %v384_v51, 0.0  ;;  %v345_v55 = vadd.f32 %v344_v52, %v135_v46  ;;  %v386_v56 = vadd.f32 %v385_v53, %v143_v47  ;;  %v390_v57 = vmax.f32 %v343_v50, 0.0  ;;  %v2170_v46 = vld [vmem:[#allocation8 + $0x3c8] ss:$16 sps:$4 sm:$0xff]   ;;  %v2175_v47 = vld [vmem:[#allocation8 + $0x1ac] ss:$16 sps:$4 sm:$0xff]  }
 0x123   :  { %v346_v58 = vpop.f32.mrf.mxu0  ;;  %v387_v59 = vpop.f32.mrf.mxu1  ;;  %v2176_v50 = vld [vmem:[#allocation8 + $0x3a8] ss:$16 sps:$4 sm:$0xff]   ;;  %v2181_v51 = vld [vmem:[#allocation8 + $0x18c] ss:$16 sps:$4 sm:$0xff]  }
 0x124   :  { %v391_v60 = vmax.f32 %v345_v55, 0.0  ;;  %v393_v61 = vmax.f32 %v386_v56, 0.0  ;;  %v2449_v62 = vpack.c.bf16 %v392_v54, %v392_v54  ;;  %v2451_v5 = vpack.c.bf16 %v390_v57, %v390_v57  ;;  %v2184_v52 = vld [vmem:[#allocation8 + $0x38c] ss:$16 sps:$4 sm:$0xff]   ;;  %v2179_v53 = vld [vmem:[#allocation8 + $0x188] ss:$16 sps:$4 sm:$0xff]  }
 0x125   :  { %v347_v63 = vpop.f32.mrf.mxu0  ;;  %v388_v0 = vpop.f32.mrf.mxu1  ;;  %v2182_v54 = vld [vmem:[#allocation8 + $0x388] ss:$16 sps:$4 sm:$0xff]   ;;  %v2187_v55 = vld [vmem:[#allocation8 + $0x16c] ss:$16 sps:$4 sm:$0xff]  }
 0x126   :  { %v395_v1 = vpack.c.bf16 %v391_v60, %v391_v60  ;;  %v397_v2 = vpack.c.bf16 %v393_v61, %v393_v61  ;;  %v2190_v56 = vld [vmem:[#allocation8 + $0x36c] ss:$16 sps:$4 sm:$0xff]   ;;  %v2185_v57 = vld [vmem:[#allocation8 + $0x168] ss:$16 sps:$4 sm:$0xff]  }
 0x127   :  { %v2188_v58 = vld [vmem:[#allocation8 + $0x368] ss:$16 sps:$4 sm:$0xff]   ;;  %v2193_v59 = vld [vmem:[#allocation8 + $0x14c] ss:$16 sps:$4 sm:$0xff]  }
 0x128   :  { %1220 = vmatprep.mubr.bf16.mxu0 %v395_v1  ;;  %1261 = vmatprep.mubr.bf16.mxu1 %v397_v2  ;;  %v2196_v60 = vld [vmem:[#allocation8 + $0x34c] ss:$16 sps:$4 sm:$0xff]   ;;  %v2191_v61 = vld [vmem:[#allocation8 + $0x148] ss:$16 sps:$4 sm:$0xff]  }
 0x129   :  { %1221 = vmatmul.mubr.bf16.vlgmr.msra.gmra.mxu0 %v2451_v5  ;;  %1262 = vmatmul.mubr.bf16.vlgmr.msra.gmra.mxu1 %v2449_v62  ;;  %v2194_v63 = vld [vmem:[#allocation8 + $0x348] ss:$16 sps:$4 sm:$0xff]   ;;  %v2199_v0 = vld [vmem:[#allocation8 + $0x12c] ss:$16 sps:$4 sm:$0xff]  }
 0x12a   :  { %1271 = vmatpush1.bf16.msra.mxu0 %v2113_v3  ;;  %1312 = vmatpush1.bf16.msra.mxu1 %v2116_v4  ;;  %v2200_v3 = vld [vmem:[#allocation8 + $0x328] ss:$16 sps:$4 sm:$0xff]   ;;  %v2205_v4 = vld [vmem:[#allocation8 + $0x10c] ss:$16 sps:$4 sm:$0xff]  }
 0x12b   :  { %1302 = vmatprep.mubr.bf16.mxu0 %v395_v1  ;;  %1343 = vmatprep.mubr.bf16.mxu1 %v397_v2  ;;  %v2202_v1 = vld [vmem:[#allocation8 + $0x32c] ss:$16 sps:$4 sm:$0xff]   ;;  %v2197_v2 = vld [vmem:[#allocation8 + $0x128] ss:$16 sps:$4 sm:$0xff]  }
 0x12c   :  { %1272 = vmatprep.subr.bf16.mxu0 %v2121_v6  ;;  %1313 = vmatprep.subr.bf16.mxu1 %v2124_v7  ;;  %v2208_v6 = vld [vmem:[#allocation8 + $0x30c] ss:$16 sps:$4 sm:$0xff]   ;;  %v2203_v7 = vld [vmem:[#allocation8 + $0x108] ss:$16 sps:$4 sm:$0xff]  }
 0x12e   :  { %1273 = vmatpush1.bf16.msra.mxu0 %v2119_v8  ;;  %1314 = vmatpush1.bf16.msra.mxu1 %v2122_v9  ;;  %v2206_v8 = vld [vmem:[#allocation8 + $0x308] ss:$16 sps:$4 sm:$0xff]  }
 0x12f   :  { %1274 = vmatprep.subr.bf16.mxu0 %v2127_v10  ;;  %1315 = vmatprep.subr.bf16.mxu1 %v2130_v11  ;;  %v2209_v9 = vld [vmem:[#allocation10 + $0x78] sm:$0xff]   ;;  %v2211_v11 = vld [vmem:[#allocation10 + $0x70] sm:$0xff]  }
 0x130   :  { %v2210_v10 = vld [vmem:[#allocation10 + $0x38] sm:$0xff]  }
 0x132   :  { %1275 = vmatpush1.bf16.msra.mxu0 %v2125_v12  ;;  %1316 = vmatpush1.bf16.msra.mxu1 %v2128_v13  ;;  %v2212_v12 = vld [vmem:[#allocation10 + $0x30] sm:$0xff]   ;;  %v2213_v13 = vld [vmem:[#allocation10 + $0x68] sm:$0xff]  }
 0x133   :  { %1276 = vmatprep.subr.bf16.mxu0 %v2133_v14  ;;  %1317 = vmatprep.subr.bf16.mxu1 %v2136_v15  ;;  %v2214_v14 = vld [vmem:[#allocation10 + $0x28] sm:$0xff]   ;;  %v2215_v15 = vld [vmem:[#allocation10 + $0x60] sm:$0xff]  }
 0x136   :  { %1277 = vmatpush1.bf16.msra.mxu0 %v2131_v16  ;;  %1318 = vmatpush1.bf16.msra.mxu1 %v2134_v17  ;;  %v2216_v16 = vld [vmem:[#allocation10 + $0x20] sm:$0xff]   ;;  %v2217_v17 = vld [vmem:[#allocation10 + $0x58] sm:$0xff]  }
 0x137   :  { %1278 = vmatprep.subr.bf16.mxu0 %v2139_v18  ;;  %1319 = vmatprep.subr.bf16.mxu1 %v2142_v19  ;;  %v2225_v18 = vld [vmem:[#allocation10 + $0xf8] sm:$0xff]  }
 0x138   :  { %v2226_v19 = vld [vmem:[#allocation10 + $0xb8] sm:$0xff]  }
 0x13a   :  { %1279 = vmatpush1.bf16.msra.mxu0 %v2137_v20  ;;  %1320 = vmatpush1.bf16.msra.mxu1 %v2140_v21  ;;  %v2227_v20 = vld [vmem:[#allocation10 + $0xf0] sm:$0xff]   ;;  %v2218_v21 = vld [vmem:[#allocation10 + $0x18] sm:$0xff]  }
 0x13b   :  { %1280 = vmatprep.subr.bf16.mxu0 %v2145_v22  ;;  %1321 = vmatprep.subr.bf16.mxu1 %v2148_v23  ;;  %v2229_v22 = vld [vmem:[#allocation10 + $0xe8] sm:$0xff]   ;;  %v2220_v23 = vld [vmem:[#allocation10 + $0x10] sm:$0xff]  }
 0x13e   :  { %1281 = vmatpush1.bf16.msra.mxu0 %v2143_v24  ;;  %1322 = vmatpush1.bf16.msra.mxu1 %v2146_v25  ;;  %v2221_v24 = vld [vmem:[#allocation10 + $0x48] sm:$0xff]  }
 0x13f   :  { %1282 = vmatprep.subr.bf16.mxu0 %v2151_v26  ;;  %1323 = vmatprep.subr.bf16.mxu1 %v2154_v27  ;;  %v2230_v25 = vld [vmem:[#allocation10 + $0xa8] sm:$0xff]   ;;  %v2231_v26 = vld [vmem:[#allocation10 + $0xe0] sm:$0xff]  }
 0x140   :  { %v2222_v27 = vld [vmem:[#allocation10 + $0x8] sm:$0xff]  }
 0x142   :  { %1283 = vmatpush1.bf16.msra.mxu0 %v2149_v28  ;;  %1324 = vmatpush1.bf16.msra.mxu1 %v2152_v29  ;;  %v2223_v28 = vld [vmem:[#allocation10 + $0x40] sm:$0xff]  }
 0x143   :  { %1284 = vmatprep.subr.bf16.mxu0 %v2157_v30  ;;  %1325 = vmatprep.subr.bf16.mxu1 %v2160_v31  ;;  %v2232_v29 = vld [vmem:[#allocation10 + $0xa0] sm:$0xff]   ;;  %v2233_v30 = vld [vmem:[#allocation10 + $0xd8] sm:$0xff]  }
 0x144   :  { %v2224_v31 = vld [vmem:[#allocation10] sm:$0xff]  }
 0x146   :  { %1285 = vmatpush1.bf16.msra.mxu0 %v2155_v32  ;;  %1326 = vmatpush1.bf16.msra.mxu1 %v2158_v33  ;;  %v2234_v32 = vld [vmem:[#allocation10 + $0x98] sm:$0xff]   ;;  %v2235_v33 = vld [vmem:[#allocation10 + $0xd0] sm:$0xff]  }
 0x147   :  { %1286 = vmatprep.subr.bf16.mxu0 %v2163_v34  ;;  %1327 = vmatprep.subr.bf16.mxu1 %v2166_v35  ;;  %v2236_v34 = vld [vmem:[#allocation10 + $0x90] sm:$0xff]   ;;  %v2237_v35 = vld [vmem:[#allocation10 + $0xc8] sm:$0xff]  }
 0x14a   :  { %1287 = vmatpush2.bf16.msra.mxu0 %v2161_v36  ;;  %1328 = vmatpush2.bf16.msra.mxu1 %v2164_v37  ;;  %v2238_v36 = vld [vmem:[#allocation10 + $0x88] sm:$0xff]   ;;  %v2239_v37 = vld [vmem:[#allocation10 + $0xc0] sm:$0xff]  }
 0x14b   :  { %1288 = vmatprep.subr.bf16.mxu0 %v2169_v41  ;;  %1329 = vmatprep.subr.bf16.mxu1 %v2172_v44  ;;  %v2240_v41 = vld [vmem:[#allocation10 + $0x80] sm:$0xff]   ;;  %v526_v44 = vld [vmem:[%s2478_s4] sm:$0xf] }
 0x14e   :  { %1289 = vmatpush2.bf16.msra.mxu0 %v2167_v45  ;;  %1330 = vmatpush2.bf16.msra.mxu1 %v2170_v46  ;;  %v531_v45 = vrot.slane %v526_v44, %v130_v39  ;;  %v535_v46 = vrot.slane %v526_v44, %v134_v42  ;;  %v539_v39 = vrot.slane %v526_v44, %v138_v40 }
 0x14f   :  { %1290 = vmatprep.subr.bf16.mxu0 %v2175_v47  ;;  %1331 = vmatprep.subr.bf16.mxu1 %v2178_v48  ;;  %v543_v42 = vrot.slane %v526_v44, %v142_v43 }
 0x152   :  { %1291 = vmatpush2.bf16.msra.mxu0 %v2173_v49  ;;  %1332 = vmatpush2.bf16.msra.mxu1 %v2176_v50 }
 0x153   :  { %1292 = vmatprep.subr.bf16.mxu0 %v2181_v51  ;;  %1333 = vmatprep.subr.bf16.mxu1 %v2184_v52 }
 0x156   :  { %1293 = vmatpush2.bf16.msra.mxu0 %v2179_v53  ;;  %1334 = vmatpush2.bf16.msra.mxu1 %v2182_v54 }
 0x157   :  { %1294 = vmatprep.subr.bf16.mxu0 %v2187_v55  ;;  %1335 = vmatprep.subr.bf16.mxu1 %v2190_v56 }
 0x15a   :  { %1295 = vmatpush2.bf16.msra.mxu0 %v2185_v57  ;;  %1336 = vmatpush2.bf16.msra.mxu1 %v2188_v58 }
 0x15b   :  { %1296 = vmatprep.subr.bf16.mxu0 %v2193_v59  ;;  %1337 = vmatprep.subr.bf16.mxu1 %v2196_v60 }
 0x15e   :  { %1297 = vmatpush2.bf16.msra.mxu0 %v2191_v61  ;;  %1338 = vmatpush2.bf16.msra.mxu1 %v2194_v63 }
 0x15f   :  { %1298 = vmatprep.subr.bf16.mxu0 %v2199_v0  ;;  %1339 = vmatprep.subr.bf16.mxu1 %v2202_v1 }
 0x162   :  { %1299 = vmatpush2.bf16.msra.mxu0 %v2197_v2  ;;  %1340 = vmatpush2.bf16.msra.mxu1 %v2200_v3 }
 0x163   :  { %1300 = vmatprep.subr.bf16.mxu0 %v2205_v4  ;;  %1341 = vmatprep.subr.bf16.mxu1 %v2208_v6 }
 0x166   :  { %1301 = vmatpush2.bf16.msra.mxu0 %v2203_v7  ;;  %1342 = vmatpush2.bf16.msra.mxu1 %v2206_v8 }
 0x167   :  { %1914 = vmatprep.subr.bf16.mxu0 %v2209_v9  ;;  %1936 = vmatprep.subr.bf16.mxu1 %v2225_v18 }
 0x169   :  { %1303 = vmatmul.mubr.bf16.vlgmr.msra.gmra.mxu0 %v2451_v5  ;;  %1344 = vmatmul.mubr.bf16.vlgmr.msra.gmra.mxu1 %v2449_v62  ;;  %v2219_v5 = vld [vmem:[#allocation10 + $0x50] sm:$0xff]  }
 0x16a   :  { %1915 = vmatpush3.bf16.msra.mxu0 %v2210_v10  ;;  %1937 = vmatpush3.bf16.msra.mxu1 %v2226_v19  ;;  %v2228_v62 = vld [vmem:[#allocation10 + $0xb0] sm:$0xff]  }
 0x16b   :  { %1916 = vmatprep.subr.bf16.mxu0 %v2211_v11  ;;  %1938 = vmatprep.subr.bf16.mxu1 %v2227_v20  ;;  %v1881_v19 = vld [vmem:[%s2480_s6] ss:$0 sm:$0xff] }
 0x16e   :  { %1917 = vmatpush3.bf16.msra.mxu0 %v2212_v12  ;;  %1939 = vmatpush3.bf16.msra.mxu1 %v2228_v62 }
 0x16f   :  { %1918 = vmatprep.subr.bf16.mxu0 %v2213_v13  ;;  %1940 = vmatprep.subr.bf16.mxu1 %v2229_v22 }
 0x172   :  { %1919 = vmatpush3.bf16.msra.mxu0 %v2214_v14  ;;  %1941 = vmatpush3.bf16.msra.mxu1 %v2230_v25 }
 0x173   :  { %1920 = vmatprep.subr.bf16.mxu0 %v2215_v15  ;;  %1942 = vmatprep.subr.bf16.mxu1 %v2231_v26 }
 0x176   :  { %1921 = vmatpush3.bf16.msra.mxu0 %v2216_v16  ;;  %1943 = vmatpush3.bf16.msra.mxu1 %v2232_v29 }
 0x177   :  { %1922 = vmatprep.subr.bf16.mxu0 %v2217_v17  ;;  %1944 = vmatprep.subr.bf16.mxu1 %v2233_v30 }
 0x17a   :  { %1923 = vmatpush3.bf16.msra.mxu0 %v2218_v21  ;;  %1945 = vmatpush3.bf16.msra.mxu1 %v2234_v32 }
 0x17b   :  { %1924 = vmatprep.subr.bf16.mxu0 %v2219_v5  ;;  %1946 = vmatprep.subr.bf16.mxu1 %v2235_v33 }
 0x17e   :  { %1925 = vmatpush3.bf16.msra.mxu0 %v2220_v23  ;;  %1947 = vmatpush3.bf16.msra.mxu1 %v2236_v34 }
 0x17f   :  { %1926 = vmatprep.subr.bf16.mxu0 %v2221_v24  ;;  %1948 = vmatprep.subr.bf16.mxu1 %v2237_v35 }
 0x182   :  { %1927 = vmatpush3.bf16.msra.mxu0 %v2222_v27  ;;  %1949 = vmatpush3.bf16.msra.mxu1 %v2238_v36 }
 0x183   :  { %1928 = vmatprep.subr.bf16.mxu0 %v2223_v28  ;;  %1950 = vmatprep.subr.bf16.mxu1 %v2239_v37 }
 0x186   :  { %1929 = vmatpush3.bf16.msra.mxu0 %v2224_v31  ;;  %1951 = vmatpush3.bf16.msra.mxu1 %v2240_v41 }
 0x1e9   :  { %v1222_v47 = vpop.f32.mrf.mxu0  ;;  %v1263_v48 = vpop.f32.mrf.mxu1 }
 0x1ea   :  { %v1223_v49 = vadd.f32 %v1222_v47, %v531_v45 }
 0x1eb   :  { %v1224_v50 = vpop.f32.mrf.mxu0  ;;  %v1265_v51 = vpop.f32.mrf.mxu1 }
 0x1ec   :  { %v1264_v52 = vadd.f32 %v1263_v48, %v1223_v49  ;;  %v1225_v53 = vadd.f32 %v1224_v50, %v535_v46 }
 0x1ed   :  { %v1226_v54 = vpop.f32.mrf.mxu0  ;;  %v1267_v55 = vpop.f32.mrf.mxu1 }
 0x1ee   :  { %v1266_v56 = vadd.f32 %v1265_v51, %v1225_v53  ;;  %v1352_v57 = vmax.f32 %v1264_v52, 0.0 }
 0x1ef   :  { %v1227_v58 = vpop.f32.mrf.mxu0  ;;  %v1268_v59 = vpop.f32.mrf.mxu1 }
 0x1f0   :  { %v1353_v60 = vmax.f32 %v1266_v56, 0.0  ;;  %v1356_v63 = vpack.c.bf16 %v1352_v57, %v1352_v57 }
 0x1f2   :  { %v1357_v61 = vpack.c.bf16 %v1353_v60, %v1353_v60 }
 0x1f4   :  { %1655 = vmatprep.mubr.bf16.mxu0 %v1357_v61 }
 0x1f5   :  { %1656 = vmatmul.mubr.bf16.vlgmr.msra.gmra.mxu0 %v1356_v63 }
 0x229   :  { %v1304_v0 = vpop.f32.mrf.mxu0  ;;  %v1345_v1 = vpop.f32.mrf.mxu1 }
 0x22a   :  { %v1305_v2 = vadd.f32 %v1304_v0, %v539_v39 }
 0x22b   :  { %v1306_v3 = vpop.f32.mrf.mxu0  ;;  %v1347_v4 = vpop.f32.mrf.mxu1 }
 0x22c   :  { %v1346_v6 = vadd.f32 %v1345_v1, %v1305_v2  ;;  %v1307_v7 = vadd.f32 %v1306_v3, %v543_v42 }
 0x22d   :  { %v1308_v8 = vpop.f32.mrf.mxu0  ;;  %v1349_v9 = vpop.f32.mrf.mxu1 }
 0x22e   :  { %v1348_v10 = vadd.f32 %v1347_v4, %v1307_v7  ;;  %v1354_v11 = vmax.f32 %v1346_v6, 0.0 }
 0x22f   :  { %v1309_v12 = vpop.f32.mrf.mxu0  ;;  %v1350_v13 = vpop.f32.mrf.mxu1 }
 0x230   :  { %v1355_v14 = vmax.f32 %v1348_v10, 0.0  ;;  %v1358_v16 = vpack.c.bf16 %v1354_v11, %v1354_v11 }
 0x232   :  { %v1359_v15 = vpack.c.bf16 %v1355_v14, %v1355_v14 }
 0x234   :  { %1695 = vmatprep.mubr.bf16.mxu1 %v1359_v15 }
 0x235   :  { %1696 = vmatmul.mubr.bf16.vlgmr.msra.gmra.mxu1 %v1358_v16 }
 0x2b5   :  { %v1930_v38 = vpop.f32.mrf.mxu0 }
 0x2b7   :  { %v1931_v40 = vpop.f32.mrf.mxu0 }
 0x2b8   :  { %v1932_v18 = vadd.f32 %v1931_v40, %v1930_v38 }
 0x2b9   :  { %v1933_v43 = vpop.f32.mrf.mxu0 }
 0x2ba   :  { %v1658_v5 = vadd.f32 %v1932_v18, %v1881_v19 }
 0x2bb   :  { %v1934_v17 = vpop.f32.mrf.mxu0 }
 0x2f5   :  { %v1952_v20 = vpop.f32.mrf.mxu1 }
 0x2f7   :  { %v1953_v21 = vpop.f32.mrf.mxu1 }
 0x2f8   :  { %v1954_v62 = vadd.f32 %v1953_v21, %v1952_v20 }
 0x2f9   :  { %v1955_v22 = vpop.f32.mrf.mxu1 }
 0x2fa   :  { %v1698_v23 = vadd.f32 %v1954_v62, %v1658_v5 }
 0x2fb   :  { %v1956_v24 = vpop.f32.mrf.mxu1 }
 0x2fc   :  { %1703 = vst [vmem:[#allocation11] sm:$0xff] %v1698_v23 }
 0x2fd   :  { %2352 = shalt.err (!%p2349_p1)
}
 0x2fe   :  { %1713 = dma.vmem_to_hbm [thread:$0]  %s1711_s29, 128, %s2481_s7, [#allocation4]  }
 0x2ff   :  { %2367 = dma.done.wait [#allocation4], 128  }
 0x300   :  { %2368 = vsyncadd [#allocation4], 4294967168 }
 0x301   :  { %1717 = vsyncpa [#allocation3], 1 }
 0x302   :  { %1718 = vsyncpa [#allocation6], 1 }
 0x303   :  { %1719 = vsyncpa [#allocation9], 1 }
 0x304   :  { %1720 = vsyncpa [#allocation4], 1 }

// kernel: tpu_custom_call.1
= control target key start
LH: loop header
LB: loop body
LE: loop exit
PB: predicated region body
PF: predicated region fallthrough
CT: control target
= control target key end

     0   :  { %12 = vsyncpa [#allocation3], 0  ;;  %s2474_s0 = inlined_call_operand.hbm [shape: f32[8,128], index: 0, kind: input, shape index: {}]   ;;  %s2475_s1 = inlined_call_operand.hbm [shape: bf16[128,512], index: 1, kind: input, shape index: {}]   ;;  %s2476_s2 = inlined_call_operand.hbm [shape: f32[1,512], index: 2, kind: input, shape index: {}]   ;;  %s2477_s3 = inlined_call_operand.hbm [shape: bf16[512,512], index: 3, kind: input, shape index: {}]   ;;  %s2478_s4 = inlined_call_operand.vmem [shape: f32[1,512], index: 4, kind: input, shape index: {}]   ;;  %s2479_s5 = inlined_call_operand.hbm [shape: bf16[512,128], index: 5, kind: input, shape index: {}]   ;;  %s2480_s6 = inlined_call_operand.vmem [shape: f32[1,128], index: 6, kind: input, shape index: {}]   ;;  %s2481_s7 = inlined_call_operand.hbm [shape: f32[8,128], index: 7, kind: output, shape index: {}]  }
   0x1   :  { %13 = vsyncpa [#allocation6], 0 }
   0x2   :  { %14 = vsyncpa [#allocation9], 0 }
   0x3   :  { %15 = vsyncpa [#allocation4], 0  ;;  %s2369_s24 = smov [#allocation5]  }
   0x4   :  { %s31_s25 = sshll.u32 %s2369_s24, 4  ;;  %s32_s25 = int_to_ptr.vmem [resolvable:$true] %s31_s25 }
   0x5   :  { %s2249_s26 = scalar_lea.vmem %s32_s25, 4096  ;;  %p2254_p1 = scmp.lt.s32.totalorder %s32_s25, %s32_s25 }
   0x6   :  { %p2250_p0 = scmp.ne.s32.totalorder %s32_s25, %s2249_s26  ;;  %p2255_p2 = scmp.lt.s32.totalorder %s2249_s26, %s2249_s26 }
   0x8   :  { %p2256_p3 = por %p2255_p2, %p2254_p1 }
   0xa   :  { %p2257_p4 = pnand %p2256_p3, %p2250_p0 }
   0xc   :  { %2260 = shalt.err (!%p2257_p4)
}
   0xd   :  { %s2370_s27 = smov 256   ;;  %s2371_s28 = smov 16  }
   0xe   :  { %37 = dma.hbm_to_vmem [thread:$0]  %s2475_s1, 4096, %s32_s25, [#allocation6], %s2370_s27, %s2370_s27, %s2371_s28  }
   0xf   :  { %s2372_s8 = smov [#allocation8]   ;;  %s2373_s10 = smov [#allocation2]  }
  0x10   :  { %s53_s9 = sshll.u32 %s2372_s8, 4  ;;  %s22_s11 = sshll.u32 %s2373_s10, 4  ;;  %s54_s9 = int_to_ptr.vmem [resolvable:$true] %s53_s9  ;;  %s23_s11 = int_to_ptr.vmem [resolvable:$true] %s22_s11 }
  0x11   :  { %s2269_s12 = scalar_lea.vmem %s54_s9, 16384  ;;  %p2274_p6 = scmp.lt.s32.totalorder %s54_s9, %s54_s9 }
  0x12   :  { %p2270_p5 = scmp.ne.s32.totalorder %s54_s9, %s2269_s12  ;;  %p2275_p7 = scmp.lt.s32.totalorder %s2269_s12, %s2269_s12 }
  0x14   :  { %p2276_p8 = por %p2275_p7, %p2274_p6 }
  0x16   :  { %p2277_p9 = pnand %p2276_p8, %p2270_p5 }
  0x18   :  { %2280 = shalt.err (!%p2277_p9)
}
  0x19   :  { %59 = dma.hbm_to_vmem [thread:$0]  %s2477_s3, 16384, %s54_s9, [#allocation9], %s2370_s27, %s2370_s27, %s2371_s28  }
  0x1a   :  { %s2289_s15 = scalar_lea.vmem %s23_s11, 128  ;;  %p2294_p11 = scmp.lt.s32.totalorder %s23_s11, %s23_s11 }
  0x1b   :  { %p2290_p10 = scmp.ne.s32.totalorder %s23_s11, %s2289_s15  ;;  %p2295_p12 = scmp.lt.s32.totalorder %s2289_s15, %s2289_s15 }
  0x1d   :  { %p2296_p13 = por %p2295_p12, %p2294_p11 }
  0x1f   :  { %p2297_p0 = pnand %p2296_p13, %p2290_p10 }
  0x21   :  { %2300 = shalt.err (!%p2297_p0)
}
  0x22   :  { %25 = dma.hbm_to_vmem [thread:$0]  %s2474_s0, 128, %s23_s11, [#allocation3]  }
  0x23   :  { %s2374_s17 = smov [#allocation7]   ;;  %s2375_s19 = smov [#allocation10]  }
  0x24   :  { %s44_s18 = sshll.u32 %s2374_s17, 4  ;;  %s67_s20 = sshll.u32 %s2375_s19, 4  ;;  %s45_s18 = int_to_ptr.vmem [resolvable:$true] %s44_s18  ;;  %s68_s20 = int_to_ptr.vmem [resolvable:$true] %s67_s20 }
  0x25   :  { %s2309_s21 = scalar_lea.vmem %s45_s18, 64  ;;  %p2314_p2 = scmp.lt.s32.totalorder %s45_s18, %s45_s18 }
  0x26   :  { %p2310_p1 = scmp.ne.s32.totalorder %s45_s18, %s2309_s21  ;;  %p2315_p3 = scmp.lt.s32.totalorder %s2309_s21, %s2309_s21 }
  0x28   :  { %p2316_p4 = por %p2315_p3, %p2314_p2 }
  0x2a   :  { %p2317_p5 = pnand %p2316_p4, %p2310_p1 }
  0x2c   :  { %2320 = shalt.err (!%p2317_p5)
}
  0x2d   :  { %47 = dma.hbm_to_vmem [thread:$0]  %s2476_s2, 64, %s45_s18, [#allocation6]  }
  0x2e   :  { %s2329_s23 = scalar_lea.vmem %s68_s20, 4096  ;;  %p2334_p7 = scmp.lt.s32.totalorder %s68_s20, %s68_s20 }
  0x2f   :  { %p2330_p6 = scmp.ne.s32.totalorder %s68_s20, %s2329_s23  ;;  %p2335_p8 = scmp.lt.s32.totalorder %s2329_s23, %s2329_s23 }
  0x31   :  { %p2336_p9 = por %p2335_p8, %p2334_p7 }
  0x33   :  { %p2337_p10 = pnand %p2336_p9, %p2330_p6 }
  0x35   :  { %2340 = shalt.err (!%p2337_p10)
}
  0x36   :  { %s2376_s0 = smov 64   ;;  %s2377_s24 = smov 4  }
  0x37   :  { %73 = dma.hbm_to_vmem [thread:$0]  %s2479_s5, 4096, %s68_s20, [#allocation9], %s2376_s0, %s2376_s0, %s2377_s24  }
  0x38   :  { %2361 = dma.done.wait [#allocation3], 128  }
  0x39   :  { %2362 = vsyncadd [#allocation3], 4294967168 }
  0x3a   :  { %2363 = dma.done.wait [#allocation6], 4160  }
  0x3b   :  { %2364 = vsyncadd [#allocation6], 4294963136 }
  0x3c   :  { %2365 = dma.done.wait [#allocation9], 20480  }
  0x3d   :  { %2366 = vsyncadd [#allocation9], 4294946816  ;;  %v2378_v0 = vmov 0   ;;  %v1969_v1 = vld [vmem:[#allocation5 + $0xe4] ss:$16 sps:$4 sm:$0xff]   ;;  %v92_v33 = vld [vmem:[#allocation2] sm:$0xff] }
  0x3e   :  { %340 = vmatprep.mubr.bf16.mxu0 %v2378_v0  ;;  %381 = vmatprep.mubr.bf16.mxu1 %v2378_v0  ;;  %v1971_v2 = vld [vmem:[#allocation5 + $0xec] ss:$16 sps:$4 sm:$0xff]   ;;  %v1973_v3 = vld [vmem:[#allocation5 + $0xe0] ss:$16 sps:$4 sm:$0xff]   ;;  %v1974_v4 = vld [vmem:[#allocation5 + $0xe8] ss:$16 sps:$4 sm:$0xff]   ;;  %v93_v36 = vpack.c.bf16 %v92_v33, %v92_v33 }
  0x3f   :  { %308 = vmatprep.subr.bf16.mxu0 %v1969_v1  ;;  %349 = vmatprep.subr.bf16.mxu1 %v1971_v2  ;;  %v1975_v5 = vld [vmem:[#allocation5 + $0xc4] ss:$16 sps:$4 sm:$0xff]   ;;  %v1977_v6 = vld [vmem:[#allocation5 + $0xcc] ss:$16 sps:$4 sm:$0xff]   ;;  %v1979_v7 = vld [vmem:[#allocation5 + $0xc0] ss:$16 sps:$4 sm:$0xff]  }
  0x40   :  { %309 = vmatpush1.bf16.msra.mxu0 %v1973_v3  ;;  %350 = vmatpush1.bf16.msra.mxu1 %v1974_v4  ;;  %v1980_v8 = vld [vmem:[#allocation5 + $0xc8] ss:$16 sps:$4 sm:$0xff]   ;;  %v1981_v9 = vld [vmem:[#allocation5 + $0xa4] ss:$16 sps:$4 sm:$0xff]   ;;  %v1983_v10 = vld [vmem:[#allocation5 + $0xac] ss:$16 sps:$4 sm:$0xff]  }
  0x41   :  { %310 = vmatprep.subr.bf16.mxu0 %v1975_v5  ;;  %351 = vmatprep.subr.bf16.mxu1 %v1977_v6  ;;  %v1985_v11 = vld [vmem:[#allocation5 + $0xa0] ss:$16 sps:$4 sm:$0xff]   ;;  %v1986_v12 = vld [vmem:[#allocation5 + $0xa8] ss:$16 sps:$4 sm:$0xff]   ;;  %v1987_v13 = vld [vmem:[#allocation5 + $0x84] ss:$16 sps:$4 sm:$0xff]  }
  0x42   :  { %v1989_v14 = vld [vmem:[#allocation5 + $0x8c] ss:$16 sps:$4 sm:$0xff]   ;;  %v1991_v15 = vld [vmem:[#allocation5 + $0x80] ss:$16 sps:$4 sm:$0xff]   ;;  %v1992_v16 = vld [vmem:[#allocation5 + $0x88] ss:$16 sps:$4 sm:$0xff]  }
  0x43   :  { %v1993_v17 = vld [vmem:[#allocation5 + $0x64] ss:$16 sps:$4 sm:$0xff]   ;;  %v1995_v18 = vld [vmem:[#allocation5 + $0x6c] ss:$16 sps:$4 sm:$0xff]   ;;  %v1997_v19 = vld [vmem:[#allocation5 + $0x60] ss:$16 sps:$4 sm:$0xff]  }
  0x44   :  { %311 = vmatpush1.bf16.msra.mxu0 %v1979_v7  ;;  %352 = vmatpush1.bf16.msra.mxu1 %v1980_v8  ;;  %v1998_v20 = vld [vmem:[#allocation5 + $0x68] ss:$16 sps:$4 sm:$0xff]   ;;  %v1999_v21 = vld [vmem:[#allocation5 + $0x44] ss:$16 sps:$4 sm:$0xff]   ;;  %v2001_v22 = vld [vmem:[#allocation5 + $0x4c] ss:$16 sps:$4 sm:$0xff]  }
  0x45   :  { %312 = vmatprep.subr.bf16.mxu0 %v1981_v9  ;;  %353 = vmatprep.subr.bf16.mxu1 %v1983_v10  ;;  %v2003_v23 = vld [vmem:[#allocation5 + $0x40] ss:$16 sps:$4 sm:$0xff]   ;;  %v2004_v24 = vld [vmem:[#allocation5 + $0x48] ss:$16 sps:$4 sm:$0xff]   ;;  %v2005_v25 = vld [vmem:[#allocation5 + $0x24] ss:$16 sps:$4 sm:$0xff]  }
  0x46   :  { %v2007_v26 = vld [vmem:[#allocation5 + $0x2c] ss:$16 sps:$4 sm:$0xff]   ;;  %v2009_v27 = vld [vmem:[#allocation5 + $0x20] ss:$16 sps:$4 sm:$0xff]   ;;  %v2010_v28 = vld [vmem:[#allocation5 + $0x28] ss:$16 sps:$4 sm:$0xff]  }
  0x47   :  { %v2011_v29 = vld [vmem:[#allocation5 + $0x4] ss:$16 sps:$4 sm:$0xff]   ;;  %v2013_v30 = vld [vmem:[#allocation5 + $0xc] ss:$16 sps:$4 sm:$0xff]   ;;  %v2015_v31 = vld [vmem:[#allocation5] ss:$16 sps:$4 sm:$0xff]  }
  0x48   :  { %313 = vmatpush1.bf16.msra.mxu0 %v1985_v11  ;;  %354 = vmatpush1.bf16.msra.mxu1 %v1986_v12  ;;  %v2016_v32 = vld [vmem:[#allocation5 + $0x8] ss:$16 sps:$4 sm:$0xff]   ;;  %v2017_v37 = vld [vmem:[#allocation8 + $0xe0] ss:$16 sps:$4 sm:$0xff]   ;;  %s2379_s28 = smov [#allocation11]  }
  0x49   :  { %314 = vmatprep.subr.bf16.mxu0 %v1987_v13  ;;  %355 = vmatprep.subr.bf16.mxu1 %v1989_v14  ;;  %v2019_v34 = vld [vmem:[#allocation8 + $0xe4] ss:$16 sps:$4 sm:$0xff]   ;;  %v2020_v38 = vld [vmem:[#allocation8 + $0x2e0] ss:$16 sps:$4 sm:$0xff]   ;;  %s1710_s29 = sshll.u32 %s2379_s28, 4  ;;  %s1711_s29 = int_to_ptr.vmem [resolvable:$true] %s1710_s29 }
  0x4a   :  { %v2022_v35 = vld [vmem:[#allocation8 + $0x2e4] ss:$16 sps:$4 sm:$0xff]   ;;  %v2023_v41 = vld [vmem:[#allocation8 + $0xc0] ss:$16 sps:$4 sm:$0xff]   ;;  %s2341_s30 = scalar_lea.vmem %s1711_s29, 128  ;;  %p2346_p12 = scmp.lt.s32.totalorder %s1711_s29, %s1711_s29 }
  0x4b   :  { %v2025_v39 = vld [vmem:[#allocation8 + $0xc4] ss:$16 sps:$4 sm:$0xff]   ;;  %v2026_v42 = vld [vmem:[#allocation8 + $0x2c0] ss:$16 sps:$4 sm:$0xff]   ;;  %p2342_p11 = scmp.ne.s32.totalorder %s1711_s29, %s2341_s30  ;;  %p2347_p13 = scmp.lt.s32.totalorder %s2341_s30, %s2341_s30 }
  0x4c   :  { %315 = vmatpush1.bf16.msra.mxu0 %v1991_v15  ;;  %356 = vmatpush1.bf16.msra.mxu1 %v1992_v16  ;;  %v2028_v40 = vld [vmem:[#allocation8 + $0x2c4] ss:$16 sps:$4 sm:$0xff]   ;;  %v2029_v45 = vld [vmem:[#allocation8 + $0xa0] ss:$16 sps:$4 sm:$0xff]  }
  0x4d   :  { %316 = vmatprep.subr.bf16.mxu0 %v1993_v17  ;;  %357 = vmatprep.subr.bf16.mxu1 %v1995_v18  ;;  %v2031_v43 = vld [vmem:[#allocation8 + $0xa4] ss:$16 sps:$4 sm:$0xff]   ;;  %v2032_v46 = vld [vmem:[#allocation8 + $0x2a0] ss:$16 sps:$4 sm:$0xff]   ;;  %p2348_p0 = por %p2347_p13, %p2346_p12 }
  0x4e   :  { %v2034_v44 = vld [vmem:[#allocation8 + $0x2a4] ss:$16 sps:$4 sm:$0xff]   ;;  %v2035_v49 = vld [vmem:[#allocation8 + $0x80] ss:$16 sps:$4 sm:$0xff]  }
  0x4f   :  { %v2037_v47 = vld [vmem:[#allocation8 + $0x84] ss:$16 sps:$4 sm:$0xff]   ;;  %v2038_v50 = vld [vmem:[#allocation8 + $0x280] ss:$16 sps:$4 sm:$0xff]   ;;  %p2349_p1 = pnand %p2348_p0, %p2342_p11 }
  0x50   :  { %317 = vmatpush1.bf16.msra.mxu0 %v1997_v19  ;;  %358 = vmatpush1.bf16.msra.mxu1 %v1998_v20  ;;  %v2040_v48 = vld [vmem:[#allocation8 + $0x284] ss:$16 sps:$4 sm:$0xff]   ;;  %v2041_v53 = vld [vmem:[#allocation8 + $0x60] ss:$16 sps:$4 sm:$0xff]  }
  0x51   :  { %318 = vmatprep.subr.bf16.mxu0 %v1999_v21  ;;  %359 = vmatprep.subr.bf16.mxu1 %v2001_v22  ;;  %v2043_v51 = vld [vmem:[#allocation8 + $0x64] ss:$16 sps:$4 sm:$0xff]   ;;  %v2044_v54 = vld [vmem:[#allocation8 + $0x260] ss:$16 sps:$4 sm:$0xff]  }
  0x52   :  { %v2046_v52 = vld [vmem:[#allocation8 + $0x264] ss:$16 sps:$4 sm:$0xff]   ;;  %v2047_v57 = vld [vmem:[#allocation8 + $0x40] ss:$16 sps:$4 sm:$0xff]  }
  0x53   :  { %v2049_v55 = vld [vmem:[#allocation8 + $0x44] ss:$16 sps:$4 sm:$0xff]   ;;  %v2050_v58 = vld [vmem:[#allocation8 + $0x240] ss:$16 sps:$4 sm:$0xff]  }
  0x54   :  { %319 = vmatpush1.bf16.msra.mxu0 %v2003_v23  ;;  %360 = vmatpush1.bf16.msra.mxu1 %v2004_v24  ;;  %v2052_v56 = vld [vmem:[#allocation8 + $0x244] ss:$16 sps:$4 sm:$0xff]   ;;  %v2053_v61 = vld [vmem:[#allocation8 + $0x20] ss:$16 sps:$4 sm:$0xff]  }
  0x55   :  { %320 = vmatprep.subr.bf16.mxu0 %v2005_v25  ;;  %361 = vmatprep.subr.bf16.mxu1 %v2007_v26  ;;  %v2055_v59 = vld [vmem:[#allocation8 + $0x24] ss:$16 sps:$4 sm:$0xff]   ;;  %v2056_v62 = vld [vmem:[#allocation8 + $0x220] ss:$16 sps:$4 sm:$0xff]  }
  0x56   :  { %v2058_v60 = vld [vmem:[#allocation8 + $0x224] ss:$16 sps:$4 sm:$0xff]   ;;  %v2059_v1 = vld [vmem:[#allocation8] ss:$16 sps:$4 sm:$0xff]  }
  0x57   :  { %v2061_v63 = vld [vmem:[#allocation8 + $0x4] ss:$16 sps:$4 sm:$0xff]   ;;  %v2062_v2 = vld [vmem:[#allocation8 + $0x200] ss:$16 sps:$4 sm:$0xff]  }
  0x58   :  { %321 = vmatpush1.bf16.msra.mxu0 %v2009_v27  ;;  %362 = vmatpush1.bf16.msra.mxu1 %v2010_v28  ;;  %v2064_v0 = vld [vmem:[#allocation8 + $0x204] ss:$16 sps:$4 sm:$0xff]   ;;  %v2065_v5 = vld [vmem:[#allocation8 + $0x1e0] ss:$16 sps:$4 sm:$0xff]  }
  0x59   :  { %322 = vmatprep.subr.bf16.mxu0 %v2011_v29  ;;  %363 = vmatprep.subr.bf16.mxu1 %v2013_v30  ;;  %v2067_v3 = vld [vmem:[#allocation8 + $0x1e4] ss:$16 sps:$4 sm:$0xff]   ;;  %v2068_v6 = vld [vmem:[#allocation8 + $0x3e0] ss:$16 sps:$4 sm:$0xff]  }
  0x5a   :  { %v2070_v4 = vld [vmem:[#allocation8 + $0x3e4] ss:$16 sps:$4 sm:$0xff]   ;;  %v2071_v9 = vld [vmem:[#allocation8 + $0x1c0] ss:$16 sps:$4 sm:$0xff]  }
  0x5b   :  { %v2073_v7 = vld [vmem:[#allocation8 + $0x1c4] ss:$16 sps:$4 sm:$0xff]   ;;  %v2074_v10 = vld [vmem:[#allocation8 + $0x3c0] ss:$16 sps:$4 sm:$0xff]  }
  0x5c   :  { %323 = vmatpush1.bf16.msra.mxu0 %v2015_v31  ;;  %364 = vmatpush1.bf16.msra.mxu1 %v2016_v32  ;;  %v2076_v8 = vld [vmem:[#allocation8 + $0x3c4] ss:$16 sps:$4 sm:$0xff]   ;;  %v2077_v13 = vld [vmem:[#allocation8 + $0x1a0] ss:$16 sps:$4 sm:$0xff]  }
  0x5d   :  { %1188 = vmatprep.subr.bf16.mxu0 %v2019_v34  ;;  %1229 = vmatprep.subr.bf16.mxu1 %v2022_v35  ;;  %v2079_v11 = vld [vmem:[#allocation8 + $0x1a4] ss:$16 sps:$4 sm:$0xff]   ;;  %v2080_v14 = vld [vmem:[#allocation8 + $0x3a0] ss:$16 sps:$4 sm:$0xff]   ;;  %v2115_v35 = vld [vmem:[#allocation8 + $0xec] ss:$16 sps:$4 sm:$0xff]  }
  0x5e   :  { %v2082_v12 = vld [vmem:[#allocation8 + $0x3a4] ss:$16 sps:$4 sm:$0xff]   ;;  %v2083_v17 = vld [vmem:[#allocation8 + $0x180] ss:$16 sps:$4 sm:$0xff]  }
  0x5f   :  { %341 = vmatmul.mubr.bf16.vlgmr.msra.gmra.mxu0 %v93_v36  ;;  %382 = vmatmul.mubr.bf16.vlgmr.msra.gmra.mxu1 %v93_v36  ;;  %v2085_v15 = vld [vmem:[#allocation8 + $0x184] ss:$16 sps:$4 sm:$0xff]   ;;  %v2086_v18 = vld [vmem:[#allocation8 + $0x380] ss:$16 sps:$4 sm:$0xff]   ;;  %v2118_v36 = vld [vmem:[#allocation8 + $0x2ec] ss:$16 sps:$4 sm:$0xff]  }
  0x60   :  { %1189 = vmatpush1.bf16.msra.mxu0 %v2017_v37  ;;  %1230 = vmatpush1.bf16.msra.mxu1 %v2020_v38  ;;  %v2088_v16 = vld [vmem:[#allocation8 + $0x384] ss:$16 sps:$4 sm:$0xff]   ;;  %v2089_v21 = vld [vmem:[#allocation8 + $0x160] ss:$16 sps:$4 sm:$0xff]   ;;  %v128_v37 = vlaneseq }
  0x61   :  { %1190 = vmatprep.subr.bf16.mxu0 %v2025_v39  ;;  %1231 = vmatprep.subr.bf16.mxu1 %v2028_v40  ;;  %v2091_v19 = vld [vmem:[#allocation8 + $0x164] ss:$16 sps:$4 sm:$0xff]   ;;  %v2092_v22 = vld [vmem:[#allocation8 + $0x360] ss:$16 sps:$4 sm:$0xff]  }
  0x62   :  { %v2094_v20 = vld [vmem:[#allocation8 + $0x364] ss:$16 sps:$4 sm:$0xff]   ;;  %v2095_v25 = vld [vmem:[#allocation8 + $0x140] ss:$16 sps:$4 sm:$0xff]   ;;  %v2435_v38 = vshrl.u32 %v128_v37, 7 }
  0x63   :  { %v2097_v23 = vld [vmem:[#allocation8 + $0x144] ss:$16 sps:$4 sm:$0xff]   ;;  %v2098_v26 = vld [vmem:[#allocation8 + $0x340] ss:$16 sps:$4 sm:$0xff]   ;;  %v2164_v37 = vld [vmem:[#allocation8 + $0x3e8] ss:$16 sps:$4 sm:$0xff]  }
  0x64   :  { %1191 = vmatpush1.bf16.msra.mxu0 %v2023_v41  ;;  %1232 = vmatpush1.bf16.msra.mxu1 %v2026_v42  ;;  %v2100_v24 = vld [vmem:[#allocation8 + $0x344] ss:$16 sps:$4 sm:$0xff]   ;;  %v2101_v29 = vld [vmem:[#allocation8 + $0x120] ss:$16 sps:$4 sm:$0xff]   ;;  %v130_v39 = vsub.s32 0, %v2435_v38  ;;  %v138_v40 = vsub.s32 2, %v2435_v38 }
  0x65   :  { %1192 = vmatprep.subr.bf16.mxu0 %v2031_v43  ;;  %1233 = vmatprep.subr.bf16.mxu1 %v2034_v44  ;;  %v2103_v27 = vld [vmem:[#allocation8 + $0x124] ss:$16 sps:$4 sm:$0xff]   ;;  %v2104_v30 = vld [vmem:[#allocation8 + $0x320] ss:$16 sps:$4 sm:$0xff]   ;;  %v126_v41 = vld [vmem:[#allocation7] sm:$0xf] }
  0x66   :  { %v2106_v28 = vld [vmem:[#allocation8 + $0x324] ss:$16 sps:$4 sm:$0xff]   ;;  %v2107_v33 = vld [vmem:[#allocation8 + $0x100] ss:$16 sps:$4 sm:$0xff]   ;;  %v134_v42 = vsub.s32 1, %v2435_v38  ;;  %v142_v43 = vsub.s32 3, %v2435_v38  ;;  %v131_v44 = vrot.slane %v126_v41, %v130_v39 }
  0x67   :  { %v2109_v31 = vld [vmem:[#allocation8 + $0x104] ss:$16 sps:$4 sm:$0xff]   ;;  %v2110_v34 = vld [vmem:[#allocation8 + $0x300] ss:$16 sps:$4 sm:$0xff]  }
  0x68   :  { %1193 = vmatpush1.bf16.msra.mxu0 %v2029_v45  ;;  %1234 = vmatpush1.bf16.msra.mxu1 %v2032_v46  ;;  %v2112_v32 = vld [vmem:[#allocation8 + $0x304] ss:$16 sps:$4 sm:$0xff]   ;;  %v139_v45 = vrot.slane %v126_v41, %v138_v40  ;;  %v135_v46 = vrot.slane %v126_v41, %v134_v42 }
  0x69   :  { %1194 = vmatprep.subr.bf16.mxu0 %v2037_v47  ;;  %1235 = vmatprep.subr.bf16.mxu1 %v2040_v48  ;;  %v143_v47 = vrot.slane %v126_v41, %v142_v43  ;;  %v2169_v41 = vld [vmem:[#allocation8 + $0x1cc] ss:$16 sps:$4 sm:$0xff]  }
  0x6c   :  { %1195 = vmatpush1.bf16.msra.mxu0 %v2035_v49  ;;  %1236 = vmatpush1.bf16.msra.mxu1 %v2038_v50 }
  0x6d   :  { %1196 = vmatprep.subr.bf16.mxu0 %v2043_v51  ;;  %1237 = vmatprep.subr.bf16.mxu1 %v2046_v52 }
  0x70   :  { %1197 = vmatpush1.bf16.msra.mxu0 %v2041_v53  ;;  %1238 = vmatpush1.bf16.msra.mxu1 %v2044_v54 }
  0x71   :  { %1198 = vmatprep.subr.bf16.mxu0 %v2049_v55  ;;  %1239 = vmatprep.subr.bf16.mxu1 %v2052_v56 }
  0x74   :  { %1199 = vmatpush1.bf16.msra.mxu0 %v2047_v57  ;;  %1240 = vmatpush1.bf16.msra.mxu1 %v2050_v58 }
  0x75   :  { %1200 = vmatprep.subr.bf16.mxu0 %v2055_v59  ;;  %1241 = vmatprep.subr.bf16.mxu1 %v2058_v60 }
  0x78   :  { %1201 = vmatpush1.bf16.msra.mxu0 %v2053_v61  ;;  %1242 = vmatpush1.bf16.msra.mxu1 %v2056_v62 }
  0x79   :  { %1202 = vmatprep.subr.bf16.mxu0 %v2061_v63  ;;  %1243 = vmatprep.subr.bf16.mxu1 %v2064_v0 }
  0x7c   :  { %1203 = vmatpush1.bf16.msra.mxu0 %v2059_v1  ;;  %1244 = vmatpush1.bf16.msra.mxu1 %v2062_v2 }
  0x7d   :  { %1204 = vmatprep.subr.bf16.mxu0 %v2067_v3  ;;  %1245 = vmatprep.subr.bf16.mxu1 %v2070_v4  ;;  %v2113_v3 = vld [vmem:[#allocation8 + $0xe8] ss:$16 sps:$4 sm:$0xff]  }
  0x7e   :  { %v2116_v4 = vld [vmem:[#allocation8 + $0x2e8] ss:$16 sps:$4 sm:$0xff]  }
  0x80   :  { %1205 = vmatpush2.bf16.msra.mxu0 %v2065_v5  ;;  %1246 = vmatpush2.bf16.msra.mxu1 %v2068_v6  ;;  %v2121_v6 = vld [vmem:[#allocation8 + $0xcc] ss:$16 sps:$4 sm:$0xff]  }
  0x81   :  { %1206 = vmatprep.subr.bf16.mxu0 %v2073_v7  ;;  %1247 = vmatprep.subr.bf16.mxu1 %v2076_v8  ;;  %v2124_v7 = vld [vmem:[#allocation8 + $0x2cc] ss:$16 sps:$4 sm:$0xff]   ;;  %v2119_v8 = vld [vmem:[#allocation8 + $0xc8] ss:$16 sps:$4 sm:$0xff]  }
  0x84   :  { %1207 = vmatpush2.bf16.msra.mxu0 %v2071_v9  ;;  %1248 = vmatpush2.bf16.msra.mxu1 %v2074_v10  ;;  %v2122_v9 = vld [vmem:[#allocation8 + $0x2c8] ss:$16 sps:$4 sm:$0xff]   ;;  %v2127_v10 = vld [vmem:[#allocation8 + $0xac] ss:$16 sps:$4 sm:$0xff]  }
  0x85   :  { %1208 = vmatprep.subr.bf16.mxu0 %v2079_v11  ;;  %1249 = vmatprep.subr.bf16.mxu1 %v2082_v12  ;;  %v2130_v11 = vld [vmem:[#allocation8 + $0x2ac] ss:$16 sps:$4 sm:$0xff]   ;;  %v2125_v12 = vld [vmem:[#allocation8 + $0xa8] ss:$16 sps:$4 sm:$0xff]  }
  0x88   :  { %1209 = vmatpush2.bf16.msra.mxu0 %v2077_v13  ;;  %1250 = vmatpush2.bf16.msra.mxu1 %v2080_v14  ;;  %v2128_v13 = vld [vmem:[#allocation8 + $0x2a8] ss:$16 sps:$4 sm:$0xff]   ;;  %v2133_v14 = vld [vmem:[#allocation8 + $0x8c] ss:$16 sps:$4 sm:$0xff]  }
  0x89   :  { %1210 = vmatprep.subr.bf16.mxu0 %v2085_v15  ;;  %1251 = vmatprep.subr.bf16.mxu1 %v2088_v16  ;;  %v2136_v15 = vld [vmem:[#allocation8 + $0x28c] ss:$16 sps:$4 sm:$0xff]   ;;  %v2131_v16 = vld [vmem:[#allocation8 + $0x88] ss:$16 sps:$4 sm:$0xff]  }
  0x8c   :  { %1211 = vmatpush2.bf16.msra.mxu0 %v2083_v17  ;;  %1252 = vmatpush2.bf16.msra.mxu1 %v2086_v18  ;;  %v2134_v17 = vld [vmem:[#allocation8 + $0x288] ss:$16 sps:$4 sm:$0xff]   ;;  %v2139_v18 = vld [vmem:[#allocation8 + $0x6c] ss:$16 sps:$4 sm:$0xff]  }
  0x8d   :  { %1212 = vmatprep.subr.bf16.mxu0 %v2091_v19  ;;  %1253 = vmatprep.subr.bf16.mxu1 %v2094_v20  ;;  %v2142_v19 = vld [vmem:[#allocation8 + $0x26c] ss:$16 sps:$4 sm:$0xff]   ;;  %v2137_v20 = vld [vmem:[#allocation8 + $0x68] ss:$16 sps:$4 sm:$0xff]  }
  0x90   :  { %1213 = vmatpush2.bf16.msra.mxu0 %v2089_v21  ;;  %1254 = vmatpush2.bf16.msra.mxu1 %v2092_v22  ;;  %v2140_v21 = vld [vmem:[#allocation8 + $0x268] ss:$16 sps:$4 sm:$0xff]   ;;  %v2145_v22 = vld [vmem:[#allocation8 + $0x4c] ss:$16 sps:$4 sm:$0xff]  }
  0x91   :  { %1214 = vmatprep.subr.bf16.mxu0 %v2097_v23  ;;  %1255 = vmatprep.subr.bf16.mxu1 %v2100_v24  ;;  %v2148_v23 = vld [vmem:[#allocation8 + $0x24c] ss:$16 sps:$4 sm:$0xff]   ;;  %v2143_v24 = vld [vmem:[#allocation8 + $0x48] ss:$16 sps:$4 sm:$0xff]  }
  0x94   :  { %1215 = vmatpush2.bf16.msra.mxu0 %v2095_v25  ;;  %1256 = vmatpush2.bf16.msra.mxu1 %v2098_v26  ;;  %v2146_v25 = vld [vmem:[#allocation8 + $0x248] ss:$16 sps:$4 sm:$0xff]   ;;  %v2151_v26 = vld [vmem:[#allocation8 + $0x2c] ss:$16 sps:$4 sm:$0xff]  }
  0x95   :  { %1216 = vmatprep.subr.bf16.mxu0 %v2103_v27  ;;  %1257 = vmatprep.subr.bf16.mxu1 %v2106_v28  ;;  %v2154_v27 = vld [vmem:[#allocation8 + $0x22c] ss:$16 sps:$4 sm:$0xff]   ;;  %v2149_v28 = vld [vmem:[#allocation8 + $0x28] ss:$16 sps:$4 sm:$0xff]  }
  0x98   :  { %1217 = vmatpush2.bf16.msra.mxu0 %v2101_v29  ;;  %1258 = vmatpush2.bf16.msra.mxu1 %v2104_v30  ;;  %v2152_v29 = vld [vmem:[#allocation8 + $0x228] ss:$16 sps:$4 sm:$0xff]   ;;  %v2157_v30 = vld [vmem:[#allocation8 + $0xc] ss:$16 sps:$4 sm:$0xff]  }
  0x99   :  { %1218 = vmatprep.subr.bf16.mxu0 %v2109_v31  ;;  %1259 = vmatprep.subr.bf16.mxu1 %v2112_v32  ;;  %v2160_v31 = vld [vmem:[#allocation8 + $0x20c] ss:$16 sps:$4 sm:$0xff]   ;;  %v2155_v32 = vld [vmem:[#allocation8 + $0x8] ss:$16 sps:$4 sm:$0xff]  }
  0x9c   :  { %1219 = vmatpush2.bf16.msra.mxu0 %v2107_v33  ;;  %1260 = vmatpush2.bf16.msra.mxu1 %v2110_v34  ;;  %v2158_v33 = vld [vmem:[#allocation8 + $0x208] ss:$16 sps:$4 sm:$0xff]   ;;  %v2163_v34 = vld [vmem:[#allocation8 + $0x1ec] ss:$16 sps:$4 sm:$0xff]  }
  0x9d   :  { %1270 = vmatprep.subr.bf16.mxu0 %v2115_v35  ;;  %1311 = vmatprep.subr.bf16.mxu1 %v2118_v36  ;;  %v2166_v35 = vld [vmem:[#allocation8 + $0x3ec] ss:$16 sps:$4 sm:$0xff]   ;;  %v2161_v36 = vld [vmem:[#allocation8 + $0x1e8] ss:$16 sps:$4 sm:$0xff]  }
 0x11f   :  { %v342_v48 = vpop.f32.mrf.mxu0  ;;  %v383_v49 = vpop.f32.mrf.mxu1 }
 0x120   :  { %v343_v50 = vadd.f32 %v342_v48, %v131_v44  ;;  %v384_v51 = vadd.f32 %v383_v49, %v139_v45  ;;  %v2172_v44 = vld [vmem:[#allocation8 + $0x3cc] ss:$16 sps:$4 sm:$0xff]   ;;  %v2167_v45 = vld [vmem:[#allocation8 + $0x1c8] ss:$16 sps:$4 sm:$0xff]  }
 0x121   :  { %v344_v52 = vpop.f32.mrf.mxu0  ;;  %v385_v53 = vpop.f32.mrf.mxu1  ;;  %v2178_v48 = vld [vmem:[#allocation8 + $0x3ac] ss:$16 sps:$4 sm:$0xff]   ;;  %v2173_v49 = vld [vmem:[#allocation8 + $0x1a8] ss:$16 sps:$4 sm:$0xff]  }
 0x122   :  { %v392_v54 = vmax.f32 %v384_v51, 0.0  ;;  %v345_v55 = vadd.f32 %v344_v52, %v135_v46  ;;  %v386_v56 = vadd.f32 %v385_v53, %v143_v47  ;;  %v390_v57 = vmax.f32 %v343_v50, 0.0  ;;  %v2170_v46 = vld [vmem:[#allocation8 + $0x3c8] ss:$16 sps:$4 sm:$0xff]   ;;  %v2175_v47 = vld [vmem:[#allocation8 + $0x1ac] ss:$16 sps:$4 sm:$0xff]  }
 0x123   :  { %v346_v58 = vpop.f32.mrf.mxu0  ;;  %v387_v59 = vpop.f32.mrf.mxu1  ;;  %v2176_v50 = vld [vmem:[#allocation8 + $0x3a8] ss:$16 sps:$4 sm:$0xff]   ;;  %v2181_v51 = vld [vmem:[#allocation8 + $0x18c] ss:$16 sps:$4 sm:$0xff]  }
 0x124   :  { %v391_v60 = vmax.f32 %v345_v55, 0.0  ;;  %v393_v61 = vmax.f32 %v386_v56, 0.0  ;;  %v2449_v62 = vpack.c.bf16 %v392_v54, %v392_v54  ;;  %v2451_v5 = vpack.c.bf16 %v390_v57, %v390_v57  ;;  %v2184_v52 = vld [vmem:[#allocation8 + $0x38c] ss:$16 sps:$4 sm:$0xff]   ;;  %v2179_v53 = vld [vmem:[#allocation8 + $0x188] ss:$16 sps:$4 sm:$0xff]  }
 0x125   :  { %v347_v63 = vpop.f32.mrf.mxu0  ;;  %v388_v0 = vpop.f32.mrf.mxu1  ;;  %v2182_v54 = vld [vmem:[#allocation8 + $0x388] ss:$16 sps:$4 sm:$0xff]   ;;  %v2187_v55 = vld [vmem:[#allocation8 + $0x16c] ss:$16 sps:$4 sm:$0xff]  }
 0x126   :  { %v395_v1 = vpack.c.bf16 %v391_v60, %v391_v60  ;;  %v397_v2 = vpack.c.bf16 %v393_v61, %v393_v61  ;;  %v2190_v56 = vld [vmem:[#allocation8 + $0x36c] ss:$16 sps:$4 sm:$0xff]   ;;  %v2185_v57 = vld [vmem:[#allocation8 + $0x168] ss:$16 sps:$4 sm:$0xff]  }
 0x127   :  { %v2188_v58 = vld [vmem:[#allocation8 + $0x368] ss:$16 sps:$4 sm:$0xff]   ;;  %v2193_v59 = vld [vmem:[#allocation8 + $0x14c] ss:$16 sps:$4 sm:$0xff]  }
 0x128   :  { %1220 = vmatprep.mubr.bf16.mxu0 %v395_v1  ;;  %1261 = vmatprep.mubr.bf16.mxu1 %v397_v2  ;;  %v2196_v60 = vld [vmem:[#allocation8 + $0x34c] ss:$16 sps:$4 sm:$0xff]   ;;  %v2191_v61 = vld [vmem:[#allocation8 + $0x148] ss:$16 sps:$4 sm:$0xff]  }
 0x129   :  { %1221 = vmatmul.mubr.bf16.vlgmr.msra.gmra.mxu0 %v2451_v5  ;;  %1262 = vmatmul.mubr.bf16.vlgmr.msra.gmra.mxu1 %v2449_v62  ;;  %v2194_v63 = vld [vmem:[#allocation8 + $0x348] ss:$16 sps:$4 sm:$0xff]   ;;  %v2199_v0 = vld [vmem:[#allocation8 + $0x12c] ss:$16 sps:$4 sm:$0xff]  }
 0x12a   :  { %1271 = vmatpush1.bf16.msra.mxu0 %v2113_v3  ;;  %1312 = vmatpush1.bf16.msra.mxu1 %v2116_v4  ;;  %v2200_v3 = vld [vmem:[#allocation8 + $0x328] ss:$16 sps:$4 sm:$0xff]   ;;  %v2205_v4 = vld [vmem:[#allocation8 + $0x10c] ss:$16 sps:$4 sm:$0xff]  }
 0x12b   :  { %1302 = vmatprep.mubr.bf16.mxu0 %v395_v1  ;;  %1343 = vmatprep.mubr.bf16.mxu1 %v397_v2  ;;  %v2202_v1 = vld [vmem:[#allocation8 + $0x32c] ss:$16 sps:$4 sm:$0xff]   ;;  %v2197_v2 = vld [vmem:[#allocation8 + $0x128] ss:$16 sps:$4 sm:$0xff]  }
 0x12c   :  { %1272 = vmatprep.subr.bf16.mxu0 %v2121_v6  ;;  %1313 = vmatprep.subr.bf16.mxu1 %v2124_v7  ;;  %v2208_v6 = vld [vmem:[#allocation8 + $0x30c] ss:$16 sps:$4 sm:$0xff]   ;;  %v2203_v7 = vld [vmem:[#allocation8 + $0x108] ss:$16 sps:$4 sm:$0xff]  }
 0x12e   :  { %1273 = vmatpush1.bf16.msra.mxu0 %v2119_v8  ;;  %1314 = vmatpush1.bf16.msra.mxu1 %v2122_v9  ;;  %v2206_v8 = vld [vmem:[#allocation8 + $0x308] ss:$16 sps:$4 sm:$0xff]  }
 0x12f   :  { %1274 = vmatprep.subr.bf16.mxu0 %v2127_v10  ;;  %1315 = vmatprep.subr.bf16.mxu1 %v2130_v11  ;;  %v2209_v9 = vld [vmem:[#allocation10 + $0x78] sm:$0xff]   ;;  %v2211_v11 = vld [vmem:[#allocation10 + $0x70] sm:$0xff]  }
 0x130   :  { %v2210_v10 = vld [vmem:[#allocation10 + $0x38] sm:$0xff]  }
 0x132   :  { %1275 = vmatpush1.bf16.msra.mxu0 %v2125_v12  ;;  %1316 = vmatpush1.bf16.msra.mxu1 %v2128_v13  ;;  %v2212_v12 = vld [vmem:[#allocation10 + $0x30] sm:$0xff]   ;;  %v2213_v13 = vld [vmem:[#allocation10 + $0x68] sm:$0xff]  }
 0x133   :  { %1276 = vmatprep.subr.bf16.mxu0 %v2133_v14  ;;  %1317 = vmatprep.subr.bf16.mxu1 %v2136_v15  ;;  %v2214_v14 = vld [vmem:[#allocation10 + $0x28] sm:$0xff]   ;;  %v2215_v15 = vld [vmem:[#allocation10 + $0x60] sm:$0xff]  }
 0x136   :  { %1277 = vmatpush1.bf16.msra.mxu0 %v2131_v16  ;;  %1318 = vmatpush1.bf16.msra.mxu1 %v2134_v17  ;;  %v2216_v16 = vld [vmem:[#allocation10 + $0x20] sm:$0xff]   ;;  %v2217_v17 = vld [vmem:[#allocation10 + $0x58] sm:$0xff]  }
 0x137   :  { %1278 = vmatprep.subr.bf16.mxu0 %v2139_v18  ;;  %1319 = vmatprep.subr.bf16.mxu1 %v2142_v19  ;;  %v2225_v18 = vld [vmem:[#allocation10 + $0xf8] sm:$0xff]  }
 0x138   :  { %v2226_v19 = vld [vmem:[#allocation10 + $0xb8] sm:$0xff]  }
 0x13a   :  { %1279 = vmatpush1.bf16.msra.mxu0 %v2137_v20  ;;  %1320 = vmatpush1.bf16.msra.mxu1 %v2140_v21  ;;  %v2227_v20 = vld [vmem:[#allocation10 + $0xf0] sm:$0xff]   ;;  %v2218_v21 = vld [vmem:[#allocation10 + $0x18] sm:$0xff]  }
 0x13b   :  { %1280 = vmatprep.subr.bf16.mxu0 %v2145_v22  ;;  %1321 = vmatprep.subr.bf16.mxu1 %v2148_v23  ;;  %v2229_v22 = vld [vmem:[#allocation10 + $0xe8] sm:$0xff]   ;;  %v2220_v23 = vld [vmem:[#allocation10 + $0x10] sm:$0xff]  }
 0x13e   :  { %1281 = vmatpush1.bf16.msra.mxu0 %v2143_v24  ;;  %1322 = vmatpush1.bf16.msra.mxu1 %v2146_v25  ;;  %v2221_v24 = vld [vmem:[#allocation10 + $0x48] sm:$0xff]  }
 0x13f   :  { %1282 = vmatprep.subr.bf16.mxu0 %v2151_v26  ;;  %1323 = vmatprep.subr.bf16.mxu1 %v2154_v27  ;;  %v2230_v25 = vld [vmem:[#allocation10 + $0xa8] sm:$0xff]   ;;  %v2231_v26 = vld [vmem:[#allocation10 + $0xe0] sm:$0xff]  }
 0x140   :  { %v2222_v27 = vld [vmem:[#allocation10 + $0x8] sm:$0xff]  }
 0x142   :  { %1283 = vmatpush1.bf16.msra.mxu0 %v2149_v28  ;;  %1324 = vmatpush1.bf16.msra.mxu1 %v2152_v29  ;;  %v2223_v28 = vld [vmem:[#allocation10 + $0x40] sm:$0xff]  }
 0x143   :  { %1284 = vmatprep.subr.bf16.mxu0 %v2157_v30  ;;  %1325 = vmatprep.subr.bf16.mxu1 %v2160_v31  ;;  %v2232_v29 = vld [vmem:[#allocation10 + $0xa0] sm:$0xff]   ;;  %v2233_v30 = vld [vmem:[#allocation10 + $0xd8] sm:$0xff]  }
 0x144   :  { %v2224_v31 = vld [vmem:[#allocation10] sm:$0xff]  }
 0x146   :  { %1285 = vmatpush1.bf16.msra.mxu0 %v2155_v32  ;;  %1326 = vmatpush1.bf16.msra.mxu1 %v2158_v33  ;;  %v2234_v32 = vld [vmem:[#allocation10 + $0x98] sm:$0xff]   ;;  %v2235_v33 = vld [vmem:[#allocation10 + $0xd0] sm:$0xff]  }
 0x147   :  { %1286 = vmatprep.subr.bf16.mxu0 %v2163_v34  ;;  %1327 = vmatprep.subr.bf16.mxu1 %v2166_v35  ;;  %v2236_v34 = vld [vmem:[#allocation10 + $0x90] sm:$0xff]   ;;  %v2237_v35 = vld [vmem:[#allocation10 + $0xc8] sm:$0xff]  }
 0x14a   :  { %1287 = vmatpush2.bf16.msra.mxu0 %v2161_v36  ;;  %1328 = vmatpush2.bf16.msra.mxu1 %v2164_v37  ;;  %v2238_v36 = vld [vmem:[#allocation10 + $0x88] sm:$0xff]   ;;  %v2239_v37 = vld [vmem:[#allocation10 + $0xc0] sm:$0xff]  }
 0x14b   :  { %1288 = vmatprep.subr.bf16.mxu0 %v2169_v41  ;;  %1329 = vmatprep.subr.bf16.mxu1 %v2172_v44  ;;  %v2240_v41 = vld [vmem:[#allocation10 + $0x80] sm:$0xff]   ;;  %v526_v44 = vld [vmem:[%s2478_s4] sm:$0xf] }
 0x14e   :  { %1289 = vmatpush2.bf16.msra.mxu0 %v2167_v45  ;;  %1330 = vmatpush2.bf16.msra.mxu1 %v2170_v46  ;;  %v531_v45 = vrot.slane %v526_v44, %v130_v39  ;;  %v535_v46 = vrot.slane %v526_v44, %v134_v42  ;;  %v539_v39 = vrot.slane %v526_v44, %v138_v40 }
 0x14f   :  { %1290 = vmatprep.subr.bf16.mxu0 %v2175_v47  ;;  %1331 = vmatprep.subr.bf16.mxu1 %v2178_v48  ;;  %v543_v42 = vrot.slane %v526_v44, %v142_v43 }
 0x152   :  { %1291 = vmatpush2.bf16.msra.mxu0 %v2173_v49  ;;  %1332 = vmatpush2.bf16.msra.mxu1 %v2176_v50 }
 0x153   :  { %1292 = vmatprep.subr.bf16.mxu0 %v2181_v51  ;;  %1333 = vmatprep.subr.bf16.mxu1 %v2184_v52 }
 0x156   :  { %1293 = vmatpush2.bf16.msra.mxu0 %v2179_v53  ;;  %1334 = vmatpush2.bf16.msra.mxu1 %v2182_v54 }
 0x157   :  { %1294 = vmatprep.subr.bf16.mxu0 %v2187_v55  ;;  %1335 = vmatprep.subr.bf16.mxu1 %v2190_v56 }
 0x15a   :  { %1295 = vmatpush2.bf16.msra.mxu0 %v2185_v57  ;;  %1336 = vmatpush2.bf16.msra.mxu1 %v2188_v58 }
 0x15b   :  { %1296 = vmatprep.subr.bf16.mxu0 %v2193_v59  ;;  %1337 = vmatprep.subr.bf16.mxu1 %v2196_v60 }
 0x15e   :  { %1297 = vmatpush2.bf16.msra.mxu0 %v2191_v61  ;;  %1338 = vmatpush2.bf16.msra.mxu1 %v2194_v63 }
 0x15f   :  { %1298 = vmatprep.subr.bf16.mxu0 %v2199_v0  ;;  %1339 = vmatprep.subr.bf16.mxu1 %v2202_v1 }
 0x162   :  { %1299 = vmatpush2.bf16.msra.mxu0 %v2197_v2  ;;  %1340 = vmatpush2.bf16.msra.mxu1 %v2200_v3 }
 0x163   :  { %1300 = vmatprep.subr.bf16.mxu0 %v2205_v4  ;;  %1341 = vmatprep.subr.bf16.mxu1 %v2208_v6 }
 0x166   :  { %1301 = vmatpush2.bf16.msra.mxu0 %v2203_v7  ;;  %1342 = vmatpush2.bf16.msra.mxu1 %v2206_v8 }
 0x167   :  { %1914 = vmatprep.subr.bf16.mxu0 %v2209_v9  ;;  %1936 = vmatprep.subr.bf16.mxu1 %v2225_v18 }
 0x169   :  { %1303 = vmatmul.mubr.bf16.vlgmr.msra.gmra.mxu0 %v2451_v5  ;;  %1344 = vmatmul.mubr.bf16.vlgmr.msra.gmra.mxu1 %v2449_v62  ;;  %v2219_v5 = vld [vmem:[#allocation10 + $0x50] sm:$0xff]  }
 0x16a   :  { %1915 = vmatpush3.bf16.msra.mxu0 %v2210_v10  ;;  %1937 = vmatpush3.bf16.msra.mxu1 %v2226_v19  ;;  %v2228_v62 = vld [vmem:[#allocation10 + $0xb0] sm:$0xff]  }
 0x16b   :  { %1916 = vmatprep.subr.bf16.mxu0 %v2211_v11  ;;  %1938 = vmatprep.subr.bf16.mxu1 %v2227_v20  ;;  %v1881_v19 = vld [vmem:[%s2480_s6] ss:$0 sm:$0xff] }
 0x16e   :  { %1917 = vmatpush3.bf16.msra.mxu0 %v2212_v12  ;;  %1939 = vmatpush3.bf16.msra.mxu1 %v2228_v62 }
 0x16f   :  { %1918 = vmatprep.subr.bf16.mxu0 %v2213_v13  ;;  %1940 = vmatprep.subr.bf16.mxu1 %v2229_v22 }
 0x172   :  { %1919 = vmatpush3.bf16.msra.mxu0 %v2214_v14  ;;  %1941 = vmatpush3.bf16.msra.mxu1 %v2230_v25 }
 0x173   :  { %1920 = vmatprep.subr.bf16.mxu0 %v2215_v15  ;;  %1942 = vmatprep.subr.bf16.mxu1 %v2231_v26 }
 0x176   :  { %1921 = vmatpush3.bf16.msra.mxu0 %v2216_v16  ;;  %1943 = vmatpush3.bf16.msra.mxu1 %v2232_v29 }
 0x177   :  { %1922 = vmatprep.subr.bf16.mxu0 %v2217_v17  ;;  %1944 = vmatprep.subr.bf16.mxu1 %v2233_v30 }
 0x17a   :  { %1923 = vmatpush3.bf16.msra.mxu0 %v2218_v21  ;;  %1945 = vmatpush3.bf16.msra.mxu1 %v2234_v32 }
 0x17b   :  { %1924 = vmatprep.subr.bf16.mxu0 %v2219_v5  ;;  %1946 = vmatprep.subr.bf16.mxu1 %v2235_v33 }
 0x17e   :  { %1925 = vmatpush3.bf16.msra.mxu0 %v2220_v23  ;;  %1947 = vmatpush3.bf16.msra.mxu1 %v2236_v34 }
 0x17f   :  { %1926 = vmatprep.subr.bf16.mxu0 %v2221_v24  ;;  %1948 = vmatprep.subr.bf16.mxu1 %v2237_v35 }
 0x182   :  { %1927 = vmatpush3.bf16.msra.mxu0 %v2222_v27  ;;  %1949 = vmatpush3.bf16.msra.mxu1 %v2238_v36 }
 0x183   :  { %1928 = vmatprep.subr.bf16.mxu0 %v2223_v28  ;;  %1950 = vmatprep.subr.bf16.mxu1 %v2239_v37 }
 0x186   :  { %1929 = vmatpush3.bf16.msra.mxu0 %v2224_v31  ;;  %1951 = vmatpush3.bf16.msra.mxu1 %v2240_v41 }
 0x1e9   :  { %v1222_v47 = vpop.f32.mrf.mxu0  ;;  %v1263_v48 = vpop.f32.mrf.mxu1 }
 0x1ea   :  { %v1223_v49 = vadd.f32 %v1222_v47, %v531_v45 }
 0x1eb   :  { %v1224_v50 = vpop.f32.mrf.mxu0  ;;  %v1265_v51 = vpop.f32.mrf.mxu1 }
 0x1ec   :  { %v1264_v52 = vadd.f32 %v1263_v48, %v1223_v49  ;;  %v1225_v53 = vadd.f32 %v1224_v50, %v535_v46 }
 0x1ed   :  { %v1226_v54 = vpop.f32.mrf.mxu0  ;;  %v1267_v55 = vpop.f32.mrf.mxu1 }
 0x1ee   :  { %v1266_v56 = vadd.f32 %v1265_v51, %v1225_v53  ;;  %v1352_v57 = vmax.f32 %v1264_v52, 0.0 }
 0x1ef   :  { %v1227_v58 = vpop.f32.mrf.mxu0  ;;  %v1268_v59 = vpop.f32.mrf.mxu1 }
 0x1f0   :  { %v1353_v60 = vmax.f32 %v1266_v56, 0.0  ;;  %v1356_v63 = vpack.c.bf16 %v1352_v57, %v1352_v57 }
 0x1f2   :  { %v1357_v61 = vpack.c.bf16 %v1353_v60, %v1353_v60 }
 0x1f4   :  { %1655 = vmatprep.mubr.bf16.mxu0 %v1357_v61 }
 0x1f5   :  { %1656 = vmatmul.mubr.bf16.vlgmr.msra.gmra.mxu0 %v1356_v63 }
 0x229   :  { %v1304_v0 = vpop.f32.mrf.mxu0  ;;  %v1345_v1 = vpop.f32.mrf.mxu1 }
 0x22a   :  { %v1305_v2 = vadd.f32 %v1304_v0, %v539_v39 }
 0x22b   :  { %v1306_v3 = vpop.f32.mrf.mxu0  ;;  %v1347_v4 = vpop.f32.mrf.mxu1 }
 0x22c   :  { %v1346_v6 = vadd.f32 %v1345_v1, %v1305_v2  ;;  %v1307_v7 = vadd.f32 %v1306_v3, %v543_v42 }
 0x22d   :  { %v1308_v8 = vpop.f32.mrf.mxu0  ;;  %v1349_v9 = vpop.f32.mrf.mxu1 }
 0x22e   :  { %v1348_v10 = vadd.f32 %v1347_v4, %v1307_v7  ;;  %v1354_v11 = vmax.f32 %v1346_v6, 0.0 }
 0x22f   :  { %v1309_v12 = vpop.f32.mrf.mxu0  ;;  %v1350_v13 = vpop.f32.mrf.mxu1 }
 0x230   :  { %v1355_v14 = vmax.f32 %v1348_v10, 0.0  ;;  %v1358_v16 = vpack.c.bf16 %v1354_v11, %v1354_v11 }
 0x232   :  { %v1359_v15 = vpack.c.bf16 %v1355_v14, %v1355_v14 }
 0x234   :  { %1695 = vmatprep.mubr.bf16.mxu1 %v1359_v15 }
 0x235   :  { %1696 = vmatmul.mubr.bf16.vlgmr.msra.gmra.mxu1 %v1358_v16 }
 0x2b5   :  { %v1930_v38 = vpop.f32.mrf.mxu0 }
 0x2b7   :  { %v1931_v40 = vpop.f32.mrf.mxu0 }
 0x2b8   :  { %v1932_v18 = vadd.f32 %v1931_v40, %v1930_v38 }
 0x2b9   :  { %v1933_v43 = vpop.f32.mrf.mxu0 }
 0x2ba   :  { %v1658_v5 = vadd.f32 %v1932_v18, %v1881_v19 }
 0x2bb   :  { %v1934_v17 = vpop.f32.mrf.mxu0 }
 0x2f5   :  { %v1952_v20 = vpop.f32.mrf.mxu1 }
 0x2f7   :  { %v1953_v21 = vpop.f32.mrf.mxu1 }
 0x2f8   :  { %v1954_v62 = vadd.f32 %v1953_v21, %v1952_v20 }
 0x2f9   :  { %v1955_v22 = vpop.f32.mrf.mxu1 }
 0x2fa   :  { %v1698_v23 = vadd.f32 %v1954_v62, %v1658_v5 }
 0x2fb   :  { %v1956_v24 = vpop.f32.mrf.mxu1 }
 0x2fc   :  { %1703 = vst [vmem:[#allocation11] sm:$0xff] %v1698_v23 }
 0x2fd   :  { %2352 = shalt.err (!%p2349_p1)
}
 0x2fe   :  { %1713 = dma.vmem_to_hbm [thread:$0]  %s1711_s29, 128, %s2481_s7, [#allocation4]  }
 0x2ff   :  { %2367 = dma.done.wait [#allocation4], 128  }
 0x300   :  { %2368 = vsyncadd [#allocation4], 4294967168 }
 0x301   :  { %1717 = vsyncpa [#allocation3], 1 }
 0x302   :  { %1718 = vsyncpa [#allocation6], 1 }
 0x303   :  { %1719 = vsyncpa [#allocation9], 1 }
 0x304   :  { %1720 = vsyncpa [#allocation4], 1 }

</bundles_post_ra>
